<compile_context>
chip_gen: v7x
topology: tpu7x:2x2x1
jax: 0.10.0
libtpu: 0.0.40
codegen_flags: <defaults>
</compile_context>

<pallas_src>
import functools

import jax
import jax.numpy as jnp
from jax.experimental import pallas as pl
from jax.experimental.pallas import tpu as pltpu

EPS = 1e-5  # PyTorch InstanceNorm2d default (affine=False, no running stats)


def _round_up(x, m):
    return ((x + m - 1) // m) * m


def _conv_in_relu_kernel(mask_ref, x_ref, w_ref, o_ref,
                         patch_ref, sum_ref, sumsq_ref, *,
                         Wp, KH, KW, C_in, K, K_pad, Tq, slab_w, inv_count):
    # mask_ref : (1, Tq)         f32   1.0 on valid flattened positions
    # x_ref    : (1, C_in, Q_in) f32   row-flattened padded input (resident per n)
    # w_ref    : (C_out, K_pad)  bf16  flattened conv weights (resident)
    # o_ref    : (1, C_out, Qpad) f32  resident output block for this n
    # patch_ref: (K_pad, Tq)     bf16  in-kernel im2col scratch
    # sum_ref / sumsq_ref : (C_out, 1) f32 streamed InstanceNorm statistics
    t = pl.program_id(1)
    n_t = pl.num_programs(1)
    q0 = pl.multiple_of(t * Tq, 128)

    @pl.when(t == 0)
    def _init():
        sum_ref[...] = jnp.zeros_like(sum_ref)
        sumsq_ref[...] = jnp.zeros_like(sumsq_ref)

    # ---- in-kernel im2col: build the (K_pad, Tq) patch matrix in VMEM ----
    # One aligned dynamic-offset load of everything this tile's taps can
    # touch; each tap is then a *static* lane shift of that slab.
    slab = x_ref[0, :, pl.ds(q0, slab_w)]                 # (C_in, slab_w) f32
    for dy in range(KH):
        for dx in range(KW):
            s = dy * Wp + dx                              # static tap shift
            k0 = (dy * KW + dx) * C_in
            patch_ref[k0:k0 + C_in, :] = slab[:, s:s + Tq].astype(patch_ref.dtype)
    if K_pad > K:
        # Zero the K-padding rows (weights there are zero too, but avoid
        # garbage * 0 -> NaN from uninitialized VMEM).
        patch_ref[K:, :] = jnp.zeros((K_pad - K, Tq), patch_ref.dtype)

    # ---- 7x7 conv as one bf16 x bf16 -> f32 MXU matmul ----
    conv = jnp.dot(w_ref[...], patch_ref[...],
                   preferred_element_type=jnp.float32)    # (C_out, Tq) f32
    # NOTE: conv bias intentionally omitted -- a per-channel constant is
    # exactly cancelled by InstanceNorm's mean subtraction.

    # ---- streamed InstanceNorm statistics (mask out wrap/pad columns) ----
    m = mask_ref[...]                                     # (1, Tq) f32
    cm = conv * m
    sum_ref[...] += jnp.sum(cm, axis=1, keepdims=True)
    sumsq_ref[...] += jnp.sum(cm * conv, axis=1, keepdims=True)

    # Stash the un-normalized conv result in the resident output block.
    o_ref[0, :, pl.ds(q0, Tq)] = conv

    # ---- last tile: normalize + ReLU the whole image in place ----
    @pl.when(t == n_t - 1)
    def _finalize():
        mean = sum_ref[...] * inv_count                   # (C_out, 1)
        var = sumsq_ref[...] * inv_count - mean * mean
        inv_std = jax.lax.rsqrt(var + EPS)
        y = o_ref[0] * inv_std - mean * inv_std           # (C_out, Qpad)
        o_ref[0] = jnp.maximum(y, 0.0)


def generator_model0_forward(x, w, b=None, *, lane_tile=1024):
    """Forward of Generator.model0 (== Generator.forward).

    x: (N, C_in, H, W) f32, w: (C_out, C_in, 7, 7) f32, b: (C_out,) f32.
    `b` is accepted for API parity but unused: InstanceNorm2d (affine=False)
    subtracts the per-channel mean, which exactly cancels the conv bias.
    """
    del b
    N, C_in, H, W = x.shape
    C_out, C_in_w, KH, KW = w.shape
    assert C_in_w == C_in and KH == 7 and KW == 7
    pad = (KH - 1) // 2                       # = 3 (ReflectionPad2d(3))
    Hp, Wp = H + 2 * pad, W + 2 * pad

    # ReflectionPad2d(3) + row-major flatten of the spatial dims (cheap glue;
    # total size ~ the raw input, no im2col blowup).
    xp = jnp.pad(x, ((0, 0), (0, 0), (pad, pad), (pad, pad)), mode="reflect")
    xflat = xp.reshape(N, C_in, Hp * Wp)

    # Flattened output positions q = y*Wp + x for y in [0,H), x in [0,Wp).
    # Columns x in [W, Wp) are over-computed "wrap" columns: masked out of the
    # statistics and sliced away below.
    Qv = H * Wp
    Tq = max(128, min(_round_up(lane_tile, 128), _round_up(Qv, 128)))
    n_tiles = pl.cdiv(Qv, Tq)
    Qpad = n_tiles * Tq

    K = C_in * KH * KW
    K_pad = _round_up(K, 256)                 # clean MXU contraction depth
    s_max = (KH - 1) * Wp + (KW - 1)
    slab_w = Tq + _round_up(s_max, 128)
    Q_in = (n_tiles - 1) * Tq + slab_w        # >= Hp*Wp, multiple of 128

    xflat = jnp.pad(xflat, ((0, 0), (0, 0), (0, Q_in - Hp * Wp)))

    # Conv weights -> (C_out, K), column order (dy, dx, c_in), zero-padded to
    # K_pad, bf16 for the MXU.
    w_col = jnp.transpose(w, (0, 2, 3, 1)).reshape(C_out, K)
    w_col = jnp.pad(w_col, ((0, 0), (0, K_pad - K))).astype(jnp.bfloat16)

    # Validity mask over flattened positions (f32, multiplies the f32 conv).
    q = jnp.arange(Qpad, dtype=jnp.int32)
    mask = (((q % Wp) < W) & (q < Qv)).astype(jnp.float32).reshape(1, Qpad)

    kern = functools.partial(
        _conv_in_relu_kernel, Wp=Wp, KH=KH, KW=KW, C_in=C_in, K=K,
        K_pad=K_pad, Tq=Tq, slab_w=slab_w, inv_count=1.0 / float(H * W))

    out_flat = pl.pallas_call(
        kern,
        out_shape=jax.ShapeDtypeStruct((N, C_out, Qpad), jnp.float32),
        grid_spec=pltpu.PrefetchScalarGridSpec(
            num_scalar_prefetch=0,
            grid=(N, n_tiles),
            in_specs=[
                pl.BlockSpec((1, Tq), lambda n, t: (0, t)),             # mask
                pl.BlockSpec((1, C_in, Q_in), lambda n, t: (n, 0, 0)),  # input
                pl.BlockSpec((C_out, K_pad), lambda n, t: (0, 0)),      # weights
            ],
            out_specs=pl.BlockSpec((1, C_out, Qpad), lambda n, t: (n, 0, 0)),
            scratch_shapes=[
                pltpu.VMEM((K_pad, Tq), jnp.bfloat16),   # patch matrix
                pltpu.VMEM((C_out, 1), jnp.float32),     # per-channel sum
                pltpu.VMEM((C_out, 1), jnp.float32),     # per-channel sum-of-squares
            ],
        ),
        compiler_params=pltpu.CompilerParams(
            dimension_semantics=("parallel", "arbitrary"),
            vmem_limit_bytes=48 * 1024 * 1024,
        ),
    )(mask, xflat, w_col)

    # Drop wrap/padding columns: (N, C_out, Qpad) -> (N, C_out, H, W).
    out = out_flat[:, :, :Qv].reshape(N, C_out, H, Wp)[:, :, :, :W]
    return out


def _reference(x, w, b):
    """Pure-JAX f32 reference of model0 (includes the conv bias)."""
    xp = jnp.pad(x, ((0, 0), (0, 0), (3, 3), (3, 3)), mode="reflect")
    out = jax.lax.conv_general_dilated(
        xp, w, window_strides=(1, 1), padding="VALID",
        dimension_numbers=("NCHW", "OIHW", "NCHW"),
        precision=jax.lax.Precision.HIGHEST)
    out = out + b.reshape(1, -1, 1, 1)
    mean = out.mean(axis=(2, 3), keepdims=True)
    var = jnp.square(out - mean).mean(axis=(2, 3), keepdims=True)
    return jnp.maximum((out - mean) * jax.lax.rsqrt(var + EPS), 0.0)


if __name__ == "__main__":
    key = jax.random.PRNGKey(0)
    k_x, k_w, k_b = jax.random.split(key, 3)

    # Small shapes consistent with the module: input_nc=4, model0 -> 64 channels.
    N, C_in, H, W = 2, 4, 16, 16
    C_out = 64

    x = jax.random.normal(k_x, (N, C_in, H, W), dtype=jnp.float32)
    w = 0.05 * jax.random.normal(k_w, (C_out, C_in, 7, 7), dtype=jnp.float32)
    b = 0.05 * jax.random.normal(k_b, (C_out,), dtype=jnp.float32)

    # lane_tile=128 -> 3 spatial tiles: exercises the streamed-statistics path.
    out = jax.block_until_ready(generator_model0_forward(x, w, b, lane_tile=128))
    assert out.shape == (N, C_out, H, W)
    assert bool(jnp.all(jnp.isfinite(out)))

    # Single-tile path (default lane_tile) must agree with the tiled path.
    out_single = jax.block_until_ready(generator_model0_forward(x, w, b))
    assert jnp.allclose(out, out_single, atol=1e-5, rtol=1e-5), "tiled vs single-tile mismatch"

    # Tight check vs a reference fed bf16-rounded operands (isolates the
    # intended bf16-operand / f32-accumulation difference).
    x_r = x.astype(jnp.bfloat16).astype(jnp.float32)
    w_r = w.astype(jnp.bfloat16).astype(jnp.float32)
    ref_bf16 = jax.block_until_ready(_reference(x_r, w_r, b))
    err_b = float(jnp.max(jnp.abs(out - ref_bf16)))
    assert jnp.allclose(out, ref_bf16, atol=5e-3, rtol=5e-3), (
        "mismatch vs bf16-operand reference, max abs err %e" % err_b)

    # Loose check vs the full-f32 reference (difference = bf16 operand rounding).
    ref_f32 = jax.block_until_ready(_reference(x, w, b))
    err_f = float(jnp.max(jnp.abs(out - ref_f32)))
    assert jnp.allclose(out, ref_f32, atol=5e-2, rtol=5e-2), (
        "mismatch vs f32 reference, max abs err %e" % err_f)

    print("KERNEL_OK")
</pallas_src>

<mosaic_0001>
module attributes {stable_mosaic.version = 11 : i64} {
  func.func @_conv_in_relu_kernel(%arg0: i32, %arg1: i32, %arg2: memref<1x128xf32, #tpu.memory_space<vmem>>, %arg3: memref<1x4x640xf32, #tpu.memory_space<vmem>>, %arg4: memref<64x256xbf16, #tpu.memory_space<vmem>>, %arg5: memref<1x64x384xf32, #tpu.memory_space<vmem>>, %arg6: memref<256x128xbf16, #tpu.memory_space<vmem>>, %arg7: memref<64x1xf32, #tpu.memory_space<vmem>>, %arg8: memref<64x1xf32, #tpu.memory_space<vmem>>) attributes {dimension_semantics = [#tpu.dimension_semantics<parallel>, #tpu.dimension_semantics<arbitrary>], iteration_bounds = array<i64: 2, 3>, scalar_prefetch = 0 : i64, scratch_operands = 3 : i64, tpu.core_type = #tpu.core_type<tc>, window_params = [{transform_indices = @transform_0, window_bounds = array<i64: 1, 128>}, {transform_indices = @transform_1, window_bounds = array<i64: 1, 4, 640>}, {pipeline_mode = #tpu.pipeline_mode<synchronous>, transform_indices = @transform_2, window_bounds = array<i64: 64, 256>}, {transform_indices = @transform_3, window_bounds = array<i64: 1, 64, 384>}]} {
    %c128_i32 = arith.constant 128 : i32
    %0 = arith.muli %arg1, %c128_i32 : i32
    %1 = tpu.assume_multiple %0, 128 : i32
    %c0_i32 = arith.constant 0 : i32
    %2 = arith.cmpi eq, %arg1, %c0_i32 : i32
    %3 = arith.extui %2 : i1 to i32
    %c0_i32_0 = arith.constant 0 : i32
    %4 = arith.cmpi ne, %3, %c0_i32_0 : i32
    scf.if %4 {
      %cst_73 = arith.constant 0.000000e+00 : f32
      %181 = vector.broadcast %cst_73 : f32 to vector<64x1xf32>
      %c0_74 = arith.constant 0 : index
      %c0_75 = arith.constant 0 : index
      %182 = vector.load %arg7[%c0_74, %c0_75] : memref<64x1xf32, #tpu.memory_space<vmem>>, vector<64x1xf32>
      tpu.vector_store %arg7[%c0_74, %c0_75], %181 {strides = array<i32>} : memref<64x1xf32, #tpu.memory_space<vmem>>, vector<64x1xf32>,
      %cst_76 = arith.constant 0.000000e+00 : f32
      %183 = vector.broadcast %cst_76 : f32 to vector<64x1xf32>
      %c0_77 = arith.constant 0 : index
      %c0_78 = arith.constant 0 : index
      %184 = vector.load %arg8[%c0_77, %c0_78] : memref<64x1xf32, #tpu.memory_space<vmem>>, vector<64x1xf32>
      tpu.vector_store %arg8[%c0_77, %c0_78], %183 {strides = array<i32>} : memref<64x1xf32, #tpu.memory_space<vmem>>, vector<64x1xf32>,
    } else {
    }
    %c0 = arith.constant 0 : index
    %c0_1 = arith.constant 0 : index
    %5 = arith.index_cast %1 : i32 to index
    %6 = vector.load %arg3[%c0, %c0_1, %5] : memref<1x4x640xf32, #tpu.memory_space<vmem>>, vector<1x4x384xf32>
    %7 = vector.shape_cast %6 : vector<1x4x384xf32> to vector<4x384xf32>
    %8 = vector.extract_strided_slice %7 {offsets = [0, 0], sizes = [4, 128], strides = [1, 1]} : vector<4x384xf32> to vector<4x128xf32>
    %9 = arith.truncf %8 : vector<4x128xf32> to vector<4x128xbf16>
    %c0_2 = arith.constant 0 : index
    %c0_3 = arith.constant 0 : index
    %10 = vector.load %arg6[%c0_2, %c0_3] : memref<256x128xbf16, #tpu.memory_space<vmem>>, vector<4x128xbf16>
    tpu.vector_store %arg6[%c0_2, %c0_3], %9 {strides = array<i32>} : memref<256x128xbf16, #tpu.memory_space<vmem>>, vector<4x128xbf16>,
    %11 = vector.extract_strided_slice %7 {offsets = [0, 1], sizes = [4, 128], strides = [1, 1]} : vector<4x384xf32> to vector<4x128xf32>
    %12 = arith.truncf %11 : vector<4x128xf32> to vector<4x128xbf16>
    %c4 = arith.constant 4 : index
    %c0_4 = arith.constant 0 : index
    %13 = vector.load %arg6[%c4, %c0_4] : memref<256x128xbf16, #tpu.memory_space<vmem>>, vector<4x128xbf16>
    tpu.vector_store %arg6[%c4, %c0_4], %12 {strides = array<i32>} : memref<256x128xbf16, #tpu.memory_space<vmem>>, vector<4x128xbf16>,
    %14 = vector.extract_strided_slice %7 {offsets = [0, 2], sizes = [4, 128], strides = [1, 1]} : vector<4x384xf32> to vector<4x128xf32>
    %15 = arith.truncf %14 : vector<4x128xf32> to vector<4x128xbf16>
    %c8 = arith.constant 8 : index
    %c0_5 = arith.constant 0 : index
    %16 = vector.load %arg6[%c8, %c0_5] : memref<256x128xbf16, #tpu.memory_space<vmem>>, vector<4x128xbf16>
    tpu.vector_store %arg6[%c8, %c0_5], %15 {strides = array<i32>} : memref<256x128xbf16, #tpu.memory_space<vmem>>, vector<4x128xbf16>,
    %17 = vector.extract_strided_slice %7 {offsets = [0, 3], sizes = [4, 128], strides = [1, 1]} : vector<4x384xf32> to vector<4x128xf32>
    %18 = arith.truncf %17 : vector<4x128xf32> to vector<4x128xbf16>
    %c12 = arith.constant 12 : index
    %c0_6 = arith.constant 0 : index
    %19 = vector.load %arg6[%c12, %c0_6] : memref<256x128xbf16, #tpu.memory_space<vmem>>, vector<4x128xbf16>
    tpu.vector_store %arg6[%c12, %c0_6], %18 {strides = array<i32>} : memref<256x128xbf16, #tpu.memory_space<vmem>>, vector<4x128xbf16>,
    %20 = vector.extract_strided_slice %7 {offsets = [0, 4], sizes = [4, 128], strides = [1, 1]} : vector<4x384xf32> to vector<4x128xf32>
    %21 = arith.truncf %20 : vector<4x128xf32> to vector<4x128xbf16>
    %c16 = arith.constant 16 : index
    %c0_7 = arith.constant 0 : index
    %22 = vector.load %arg6[%c16, %c0_7] : memref<256x128xbf16, #tpu.memory_space<vmem>>, vector<4x128xbf16>
    tpu.vector_store %arg6[%c16, %c0_7], %21 {strides = array<i32>} : memref<256x128xbf16, #tpu.memory_space<vmem>>, vector<4x128xbf16>,
    %23 = vector.extract_strided_slice %7 {offsets = [0, 5], sizes = [4, 128], strides = [1, 1]} : vector<4x384xf32> to vector<4x128xf32>
    %24 = arith.truncf %23 : vector<4x128xf32> to vector<4x128xbf16>
    %c20 = arith.constant 20 : index
    %c0_8 = arith.constant 0 : index
    %25 = vector.load %arg6[%c20, %c0_8] : memref<256x128xbf16, #tpu.memory_space<vmem>>, vector<4x128xbf16>
    tpu.vector_store %arg6[%c20, %c0_8], %24 {strides = array<i32>} : memref<256x128xbf16, #tpu.memory_space<vmem>>, vector<4x128xbf16>,
    %26 = vector.extract_strided_slice %7 {offsets = [0, 6], sizes = [4, 128], strides = [1, 1]} : vector<4x384xf32> to vector<4x128xf32>
    %27 = arith.truncf %26 : vector<4x128xf32> to vector<4x128xbf16>
    %c24 = arith.constant 24 : index
    %c0_9 = arith.constant 0 : index
    %28 = vector.load %arg6[%c24, %c0_9] : memref<256x128xbf16, #tpu.memory_space<vmem>>, vector<4x128xbf16>
    tpu.vector_store %arg6[%c24, %c0_9], %27 {strides = array<i32>} : memref<256x128xbf16, #tpu.memory_space<vmem>>, vector<4x128xbf16>,
    %29 = vector.extract_strided_slice %7 {offsets = [0, 22], sizes = [4, 128], strides = [1, 1]} : vector<4x384xf32> to vector<4x128xf32>
    %30 = arith.truncf %29 : vector<4x128xf32> to vector<4x128xbf16>
    %c28 = arith.constant 28 : index
    %c0_10 = arith.constant 0 : index
    %31 = vector.load %arg6[%c28, %c0_10] : memref<256x128xbf16, #tpu.memory_space<vmem>>, vector<4x128xbf16>
    tpu.vector_store %arg6[%c28, %c0_10], %30 {strides = array<i32>} : memref<256x128xbf16, #tpu.memory_space<vmem>>, vector<4x128xbf16>,
    %32 = vector.extract_strided_slice %7 {offsets = [0, 23], sizes = [4, 128], strides = [1, 1]} : vector<4x384xf32> to vector<4x128xf32>
    %33 = arith.truncf %32 : vector<4x128xf32> to vector<4x128xbf16>
    %c32 = arith.constant 32 : index
    %c0_11 = arith.constant 0 : index
    %34 = vector.load %arg6[%c32, %c0_11] : memref<256x128xbf16, #tpu.memory_space<vmem>>, vector<4x128xbf16>
    tpu.vector_store %arg6[%c32, %c0_11], %33 {strides = array<i32>} : memref<256x128xbf16, #tpu.memory_space<vmem>>, vector<4x128xbf16>,
    %35 = vector.extract_strided_slice %7 {offsets = [0, 24], sizes = [4, 128], strides = [1, 1]} : vector<4x384xf32> to vector<4x128xf32>
    %36 = arith.truncf %35 : vector<4x128xf32> to vector<4x128xbf16>
    %c36 = arith.constant 36 : index
    %c0_12 = arith.constant 0 : index
    %37 = vector.load %arg6[%c36, %c0_12] : memref<256x128xbf16, #tpu.memory_space<vmem>>, vector<4x128xbf16>
    tpu.vector_store %arg6[%c36, %c0_12], %36 {strides = array<i32>} : memref<256x128xbf16, #tpu.memory_space<vmem>>, vector<4x128xbf16>,
    %38 = vector.extract_strided_slice %7 {offsets = [0, 25], sizes = [4, 128], strides = [1, 1]} : vector<4x384xf32> to vector<4x128xf32>
    %39 = arith.truncf %38 : vector<4x128xf32> to vector<4x128xbf16>
    %c40 = arith.constant 40 : index
    %c0_13 = arith.constant 0 : index
    %40 = vector.load %arg6[%c40, %c0_13] : memref<256x128xbf16, #tpu.memory_space<vmem>>, vector<4x128xbf16>
    tpu.vector_store %arg6[%c40, %c0_13], %39 {strides = array<i32>} : memref<256x128xbf16, #tpu.memory_space<vmem>>, vector<4x128xbf16>,
    %41 = vector.extract_strided_slice %7 {offsets = [0, 26], sizes = [4, 128], strides = [1, 1]} : vector<4x384xf32> to vector<4x128xf32>
    %42 = arith.truncf %41 : vector<4x128xf32> to vector<4x128xbf16>
    %c44 = arith.constant 44 : index
    %c0_14 = arith.constant 0 : index
    %43 = vector.load %arg6[%c44, %c0_14] : memref<256x128xbf16, #tpu.memory_space<vmem>>, vector<4x128xbf16>
    tpu.vector_store %arg6[%c44, %c0_14], %42 {strides = array<i32>} : memref<256x128xbf16, #tpu.memory_space<vmem>>, vector<4x128xbf16>,
    %44 = vector.extract_strided_slice %7 {offsets = [0, 27], sizes = [4, 128], strides = [1, 1]} : vector<4x384xf32> to vector<4x128xf32>
    %45 = arith.truncf %44 : vector<4x128xf32> to vector<4x128xbf16>
    %c48 = arith.constant 48 : index
    %c0_15 = arith.constant 0 : index
    %46 = vector.load %arg6[%c48, %c0_15] : memref<256x128xbf16, #tpu.memory_space<vmem>>, vector<4x128xbf16>
    tpu.vector_store %arg6[%c48, %c0_15], %45 {strides = array<i32>} : memref<256x128xbf16, #tpu.memory_space<vmem>>, vector<4x128xbf16>,
    %47 = vector.extract_strided_slice %7 {offsets = [0, 28], sizes = [4, 128], strides = [1, 1]} : vector<4x384xf32> to vector<4x128xf32>
    %48 = arith.truncf %47 : vector<4x128xf32> to vector<4x128xbf16>
    %c52 = arith.constant 52 : index
    %c0_16 = arith.constant 0 : index
    %49 = vector.load %arg6[%c52, %c0_16] : memref<256x128xbf16, #tpu.memory_space<vmem>>, vector<4x128xbf16>
    tpu.vector_store %arg6[%c52, %c0_16], %48 {strides = array<i32>} : memref<256x128xbf16, #tpu.memory_space<vmem>>, vector<4x128xbf16>,
    %50 = vector.extract_strided_slice %7 {offsets = [0, 44], sizes = [4, 128], strides = [1, 1]} : vector<4x384xf32> to vector<4x128xf32>
    %51 = arith.truncf %50 : vector<4x128xf32> to vector<4x128xbf16>
    %c56 = arith.constant 56 : index
    %c0_17 = arith.constant 0 : index
    %52 = vector.load %arg6[%c56, %c0_17] : memref<256x128xbf16, #tpu.memory_space<vmem>>, vector<4x128xbf16>
    tpu.vector_store %arg6[%c56, %c0_17], %51 {strides = array<i32>} : memref<256x128xbf16, #tpu.memory_space<vmem>>, vector<4x128xbf16>,
    %53 = vector.extract_strided_slice %7 {offsets = [0, 45], sizes = [4, 128], strides = [1, 1]} : vector<4x384xf32> to vector<4x128xf32>
    %54 = arith.truncf %53 : vector<4x128xf32> to vector<4x128xbf16>
    %c60 = arith.constant 60 : index
    %c0_18 = arith.constant 0 : index
    %55 = vector.load %arg6[%c60, %c0_18] : memref<256x128xbf16, #tpu.memory_space<vmem>>, vector<4x128xbf16>
    tpu.vector_store %arg6[%c60, %c0_18], %54 {strides = array<i32>} : memref<256x128xbf16, #tpu.memory_space<vmem>>, vector<4x128xbf16>,
    %56 = vector.extract_strided_slice %7 {offsets = [0, 46], sizes = [4, 128], strides = [1, 1]} : vector<4x384xf32> to vector<4x128xf32>
    %57 = arith.truncf %56 : vector<4x128xf32> to vector<4x128xbf16>
    %c64 = arith.constant 64 : index
    %c0_19 = arith.constant 0 : index
    %58 = vector.load %arg6[%c64, %c0_19] : memref<256x128xbf16, #tpu.memory_space<vmem>>, vector<4x128xbf16>
    tpu.vector_store %arg6[%c64, %c0_19], %57 {strides = array<i32>} : memref<256x128xbf16, #tpu.memory_space<vmem>>, vector<4x128xbf16>,
    %59 = vector.extract_strided_slice %7 {offsets = [0, 47], sizes = [4, 128], strides = [1, 1]} : vector<4x384xf32> to vector<4x128xf32>
    %60 = arith.truncf %59 : vector<4x128xf32> to vector<4x128xbf16>
    %c68 = arith.constant 68 : index
    %c0_20 = arith.constant 0 : index
    %61 = vector.load %arg6[%c68, %c0_20] : memref<256x128xbf16, #tpu.memory_space<vmem>>, vector<4x128xbf16>
    tpu.vector_store %arg6[%c68, %c0_20], %60 {strides = array<i32>} : memref<256x128xbf16, #tpu.memory_space<vmem>>, vector<4x128xbf16>,
    %62 = vector.extract_strided_slice %7 {offsets = [0, 48], sizes = [4, 128], strides = [1, 1]} : vector<4x384xf32> to vector<4x128xf32>
    %63 = arith.truncf %62 : vector<4x128xf32> to vector<4x128xbf16>
    %c72 = arith.constant 72 : index
    %c0_21 = arith.constant 0 : index
    %64 = vector.load %arg6[%c72, %c0_21] : memref<256x128xbf16, #tpu.memory_space<vmem>>, vector<4x128xbf16>
    tpu.vector_store %arg6[%c72, %c0_21], %63 {strides = array<i32>} : memref<256x128xbf16, #tpu.memory_space<vmem>>, vector<4x128xbf16>,
    %65 = vector.extract_strided_slice %7 {offsets = [0, 49], sizes = [4, 128], strides = [1, 1]} : vector<4x384xf32> to vector<4x128xf32>
    %66 = arith.truncf %65 : vector<4x128xf32> to vector<4x128xbf16>
    %c76 = arith.constant 76 : index
    %c0_22 = arith.constant 0 : index
    %67 = vector.load %arg6[%c76, %c0_22] : memref<256x128xbf16, #tpu.memory_space<vmem>>, vector<4x128xbf16>
    tpu.vector_store %arg6[%c76, %c0_22], %66 {strides = array<i32>} : memref<256x128xbf16, #tpu.memory_space<vmem>>, vector<4x128xbf16>,
    %68 = vector.extract_strided_slice %7 {offsets = [0, 50], sizes = [4, 128], strides = [1, 1]} : vector<4x384xf32> to vector<4x128xf32>
    %69 = arith.truncf %68 : vector<4x128xf32> to vector<4x128xbf16>
    %c80 = arith.constant 80 : index
    %c0_23 = arith.constant 0 : index
    %70 = vector.load %arg6[%c80, %c0_23] : memref<256x128xbf16, #tpu.memory_space<vmem>>, vector<4x128xbf16>
    tpu.vector_store %arg6[%c80, %c0_23], %69 {strides = array<i32>} : memref<256x128xbf16, #tpu.memory_space<vmem>>, vector<4x128xbf16>,
    %71 = vector.extract_strided_slice %7 {offsets = [0, 66], sizes = [4, 128], strides = [1, 1]} : vector<4x384xf32> to vector<4x128xf32>
    %72 = arith.truncf %71 : vector<4x128xf32> to vector<4x128xbf16>
    %c84 = arith.constant 84 : index
    %c0_24 = arith.constant 0 : index
    %73 = vector.load %arg6[%c84, %c0_24] : memref<256x128xbf16, #tpu.memory_space<vmem>>, vector<4x128xbf16>
    tpu.vector_store %arg6[%c84, %c0_24], %72 {strides = array<i32>} : memref<256x128xbf16, #tpu.memory_space<vmem>>, vector<4x128xbf16>,
    %74 = vector.extract_strided_slice %7 {offsets = [0, 67], sizes = [4, 128], strides = [1, 1]} : vector<4x384xf32> to vector<4x128xf32>
    %75 = arith.truncf %74 : vector<4x128xf32> to vector<4x128xbf16>
    %c88 = arith.constant 88 : index
    %c0_25 = arith.constant 0 : index
    %76 = vector.load %arg6[%c88, %c0_25] : memref<256x128xbf16, #tpu.memory_space<vmem>>, vector<4x128xbf16>
    tpu.vector_store %arg6[%c88, %c0_25], %75 {strides = array<i32>} : memref<256x128xbf16, #tpu.memory_space<vmem>>, vector<4x128xbf16>,
    %77 = vector.extract_strided_slice %7 {offsets = [0, 68], sizes = [4, 128], strides = [1, 1]} : vector<4x384xf32> to vector<4x128xf32>
    %78 = arith.truncf %77 : vector<4x128xf32> to vector<4x128xbf16>
    %c92 = arith.constant 92 : index
    %c0_26 = arith.constant 0 : index
    %79 = vector.load %arg6[%c92, %c0_26] : memref<256x128xbf16, #tpu.memory_space<vmem>>, vector<4x128xbf16>
    tpu.vector_store %arg6[%c92, %c0_26], %78 {strides = array<i32>} : memref<256x128xbf16, #tpu.memory_space<vmem>>, vector<4x128xbf16>,
    %80 = vector.extract_strided_slice %7 {offsets = [0, 69], sizes = [4, 128], strides = [1, 1]} : vector<4x384xf32> to vector<4x128xf32>
    %81 = arith.truncf %80 : vector<4x128xf32> to vector<4x128xbf16>
    %c96 = arith.constant 96 : index
    %c0_27 = arith.constant 0 : index
    %82 = vector.load %arg6[%c96, %c0_27] : memref<256x128xbf16, #tpu.memory_space<vmem>>, vector<4x128xbf16>
    tpu.vector_store %arg6[%c96, %c0_27], %81 {strides = array<i32>} : memref<256x128xbf16, #tpu.memory_space<vmem>>, vector<4x128xbf16>,
    %83 = vector.extract_strided_slice %7 {offsets = [0, 70], sizes = [4, 128], strides = [1, 1]} : vector<4x384xf32> to vector<4x128xf32>
    %84 = arith.truncf %83 : vector<4x128xf32> to vector<4x128xbf16>
    %c100 = arith.constant 100 : index
    %c0_28 = arith.constant 0 : index
    %85 = vector.load %arg6[%c100, %c0_28] : memref<256x128xbf16, #tpu.memory_space<vmem>>, vector<4x128xbf16>
    tpu.vector_store %arg6[%c100, %c0_28], %84 {strides = array<i32>} : memref<256x128xbf16, #tpu.memory_space<vmem>>, vector<4x128xbf16>,
    %86 = vector.extract_strided_slice %7 {offsets = [0, 71], sizes = [4, 128], strides = [1, 1]} : vector<4x384xf32> to vector<4x128xf32>
    %87 = arith.truncf %86 : vector<4x128xf32> to vector<4x128xbf16>
    %c104 = arith.constant 104 : index
    %c0_29 = arith.constant 0 : index
    %88 = vector.load %arg6[%c104, %c0_29] : memref<256x128xbf16, #tpu.memory_space<vmem>>, vector<4x128xbf16>
    tpu.vector_store %arg6[%c104, %c0_29], %87 {strides = array<i32>} : memref<256x128xbf16, #tpu.memory_space<vmem>>, vector<4x128xbf16>,
    %89 = vector.extract_strided_slice %7 {offsets = [0, 72], sizes = [4, 128], strides = [1, 1]} : vector<4x384xf32> to vector<4x128xf32>
    %90 = arith.truncf %89 : vector<4x128xf32> to vector<4x128xbf16>
    %c108 = arith.constant 108 : index
    %c0_30 = arith.constant 0 : index
    %91 = vector.load %arg6[%c108, %c0_30] : memref<256x128xbf16, #tpu.memory_space<vmem>>, vector<4x128xbf16>
    tpu.vector_store %arg6[%c108, %c0_30], %90 {strides = array<i32>} : memref<256x128xbf16, #tpu.memory_space<vmem>>, vector<4x128xbf16>,
    %92 = vector.extract_strided_slice %7 {offsets = [0, 88], sizes = [4, 128], strides = [1, 1]} : vector<4x384xf32> to vector<4x128xf32>
    %93 = arith.truncf %92 : vector<4x128xf32> to vector<4x128xbf16>
    %c112 = arith.constant 112 : index
    %c0_31 = arith.constant 0 : index
    %94 = vector.load %arg6[%c112, %c0_31] : memref<256x128xbf16, #tpu.memory_space<vmem>>, vector<4x128xbf16>
    tpu.vector_store %arg6[%c112, %c0_31], %93 {strides = array<i32>} : memref<256x128xbf16, #tpu.memory_space<vmem>>, vector<4x128xbf16>,
    %95 = vector.extract_strided_slice %7 {offsets = [0, 89], sizes = [4, 128], strides = [1, 1]} : vector<4x384xf32> to vector<4x128xf32>
    %96 = arith.truncf %95 : vector<4x128xf32> to vector<4x128xbf16>
    %c116 = arith.constant 116 : index
    %c0_32 = arith.constant 0 : index
    %97 = vector.load %arg6[%c116, %c0_32] : memref<256x128xbf16, #tpu.memory_space<vmem>>, vector<4x128xbf16>
    tpu.vector_store %arg6[%c116, %c0_32], %96 {strides = array<i32>} : memref<256x128xbf16, #tpu.memory_space<vmem>>, vector<4x128xbf16>,
    %98 = vector.extract_strided_slice %7 {offsets = [0, 90], sizes = [4, 128], strides = [1, 1]} : vector<4x384xf32> to vector<4x128xf32>
    %99 = arith.truncf %98 : vector<4x128xf32> to vector<4x128xbf16>
    %c120 = arith.constant 120 : index
    %c0_33 = arith.constant 0 : index
    %100 = vector.load %arg6[%c120, %c0_33] : memref<256x128xbf16, #tpu.memory_space<vmem>>, vector<4x128xbf16>
    tpu.vector_store %arg6[%c120, %c0_33], %99 {strides = array<i32>} : memref<256x128xbf16, #tpu.memory_space<vmem>>, vector<4x128xbf16>,
    %101 = vector.extract_strided_slice %7 {offsets = [0, 91], sizes = [4, 128], strides = [1, 1]} : vector<4x384xf32> to vector<4x128xf32>
    %102 = arith.truncf %101 : vector<4x128xf32> to vector<4x128xbf16>
    %c124 = arith.constant 124 : index
    %c0_34 = arith.constant 0 : index
    %103 = vector.load %arg6[%c124, %c0_34] : memref<256x128xbf16, #tpu.memory_space<vmem>>, vector<4x128xbf16>
    tpu.vector_store %arg6[%c124, %c0_34], %102 {strides = array<i32>} : memref<256x128xbf16, #tpu.memory_space<vmem>>, vector<4x128xbf16>,
    %104 = vector.extract_strided_slice %7 {offsets = [0, 92], sizes = [4, 128], strides = [1, 1]} : vector<4x384xf32> to vector<4x128xf32>
    %105 = arith.truncf %104 : vector<4x128xf32> to vector<4x128xbf16>
    %c128 = arith.constant 128 : index
    %c0_35 = arith.constant 0 : index
    %106 = vector.load %arg6[%c128, %c0_35] : memref<256x128xbf16, #tpu.memory_space<vmem>>, vector<4x128xbf16>
    tpu.vector_store %arg6[%c128, %c0_35], %105 {strides = array<i32>} : memref<256x128xbf16, #tpu.memory_space<vmem>>, vector<4x128xbf16>,
    %107 = vector.extract_strided_slice %7 {offsets = [0, 93], sizes = [4, 128], strides = [1, 1]} : vector<4x384xf32> to vector<4x128xf32>
    %108 = arith.truncf %107 : vector<4x128xf32> to vector<4x128xbf16>
    %c132 = arith.constant 132 : index
    %c0_36 = arith.constant 0 : index
    %109 = vector.load %arg6[%c132, %c0_36] : memref<256x128xbf16, #tpu.memory_space<vmem>>, vector<4x128xbf16>
    tpu.vector_store %arg6[%c132, %c0_36], %108 {strides = array<i32>} : memref<256x128xbf16, #tpu.memory_space<vmem>>, vector<4x128xbf16>,
    %110 = vector.extract_strided_slice %7 {offsets = [0, 94], sizes = [4, 128], strides = [1, 1]} : vector<4x384xf32> to vector<4x128xf32>
    %111 = arith.truncf %110 : vector<4x128xf32> to vector<4x128xbf16>
    %c136 = arith.constant 136 : index
    %c0_37 = arith.constant 0 : index
    %112 = vector.load %arg6[%c136, %c0_37] : memref<256x128xbf16, #tpu.memory_space<vmem>>, vector<4x128xbf16>
    tpu.vector_store %arg6[%c136, %c0_37], %111 {strides = array<i32>} : memref<256x128xbf16, #tpu.memory_space<vmem>>, vector<4x128xbf16>,
    %113 = vector.extract_strided_slice %7 {offsets = [0, 110], sizes = [4, 128], strides = [1, 1]} : vector<4x384xf32> to vector<4x128xf32>
    %114 = arith.truncf %113 : vector<4x128xf32> to vector<4x128xbf16>
    %c140 = arith.constant 140 : index
    %c0_38 = arith.constant 0 : index
    %115 = vector.load %arg6[%c140, %c0_38] : memref<256x128xbf16, #tpu.memory_space<vmem>>, vector<4x128xbf16>
    tpu.vector_store %arg6[%c140, %c0_38], %114 {strides = array<i32>} : memref<256x128xbf16, #tpu.memory_space<vmem>>, vector<4x128xbf16>,
    %116 = vector.extract_strided_slice %7 {offsets = [0, 111], sizes = [4, 128], strides = [1, 1]} : vector<4x384xf32> to vector<4x128xf32>
    %117 = arith.truncf %116 : vector<4x128xf32> to vector<4x128xbf16>
    %c144 = arith.constant 144 : index
    %c0_39 = arith.constant 0 : index
    %118 = vector.load %arg6[%c144, %c0_39] : memref<256x128xbf16, #tpu.memory_space<vmem>>, vector<4x128xbf16>
    tpu.vector_store %arg6[%c144, %c0_39], %117 {strides = array<i32>} : memref<256x128xbf16, #tpu.memory_space<vmem>>, vector<4x128xbf16>,
    %119 = vector.extract_strided_slice %7 {offsets = [0, 112], sizes = [4, 128], strides = [1, 1]} : vector<4x384xf32> to vector<4x128xf32>
    %120 = arith.truncf %119 : vector<4x128xf32> to vector<4x128xbf16>
    %c148 = arith.constant 148 : index
    %c0_40 = arith.constant 0 : index
    %121 = vector.load %arg6[%c148, %c0_40] : memref<256x128xbf16, #tpu.memory_space<vmem>>, vector<4x128xbf16>
    tpu.vector_store %arg6[%c148, %c0_40], %120 {strides = array<i32>} : memref<256x128xbf16, #tpu.memory_space<vmem>>, vector<4x128xbf16>,
    %122 = vector.extract_strided_slice %7 {offsets = [0, 113], sizes = [4, 128], strides = [1, 1]} : vector<4x384xf32> to vector<4x128xf32>
    %123 = arith.truncf %122 : vector<4x128xf32> to vector<4x128xbf16>
    %c152 = arith.constant 152 : index
    %c0_41 = arith.constant 0 : index
    %124 = vector.load %arg6[%c152, %c0_41] : memref<256x128xbf16, #tpu.memory_space<vmem>>, vector<4x128xbf16>
    tpu.vector_store %arg6[%c152, %c0_41], %123 {strides = array<i32>} : memref<256x128xbf16, #tpu.memory_space<vmem>>, vector<4x128xbf16>,
    %125 = vector.extract_strided_slice %7 {offsets = [0, 114], sizes = [4, 128], strides = [1, 1]} : vector<4x384xf32> to vector<4x128xf32>
    %126 = arith.truncf %125 : vector<4x128xf32> to vector<4x128xbf16>
    %c156 = arith.constant 156 : index
    %c0_42 = arith.constant 0 : index
    %127 = vector.load %arg6[%c156, %c0_42] : memref<256x128xbf16, #tpu.memory_space<vmem>>, vector<4x128xbf16>
    tpu.vector_store %arg6[%c156, %c0_42], %126 {strides = array<i32>} : memref<256x128xbf16, #tpu.memory_space<vmem>>, vector<4x128xbf16>,
    %128 = vector.extract_strided_slice %7 {offsets = [0, 115], sizes = [4, 128], strides = [1, 1]} : vector<4x384xf32> to vector<4x128xf32>
    %129 = arith.truncf %128 : vector<4x128xf32> to vector<4x128xbf16>
    %c160 = arith.constant 160 : index
    %c0_43 = arith.constant 0 : index
    %130 = vector.load %arg6[%c160, %c0_43] : memref<256x128xbf16, #tpu.memory_space<vmem>>, vector<4x128xbf16>
    tpu.vector_store %arg6[%c160, %c0_43], %129 {strides = array<i32>} : memref<256x128xbf16, #tpu.memory_space<vmem>>, vector<4x128xbf16>,
    %131 = vector.extract_strided_slice %7 {offsets = [0, 116], sizes = [4, 128], strides = [1, 1]} : vector<4x384xf32> to vector<4x128xf32>
    %132 = arith.truncf %131 : vector<4x128xf32> to vector<4x128xbf16>
    %c164 = arith.constant 164 : index
    %c0_44 = arith.constant 0 : index
    %133 = vector.load %arg6[%c164, %c0_44] : memref<256x128xbf16, #tpu.memory_space<vmem>>, vector<4x128xbf16>
    tpu.vector_store %arg6[%c164, %c0_44], %132 {strides = array<i32>} : memref<256x128xbf16, #tpu.memory_space<vmem>>, vector<4x128xbf16>,
    %134 = vector.extract_strided_slice %7 {offsets = [0, 132], sizes = [4, 128], strides = [1, 1]} : vector<4x384xf32> to vector<4x128xf32>
    %135 = arith.truncf %134 : vector<4x128xf32> to vector<4x128xbf16>
    %c168 = arith.constant 168 : index
    %c0_45 = arith.constant 0 : index
    %136 = vector.load %arg6[%c168, %c0_45] : memref<256x128xbf16, #tpu.memory_space<vmem>>, vector<4x128xbf16>
    tpu.vector_store %arg6[%c168, %c0_45], %135 {strides = array<i32>} : memref<256x128xbf16, #tpu.memory_space<vmem>>, vector<4x128xbf16>,
    %137 = vector.extract_strided_slice %7 {offsets = [0, 133], sizes = [4, 128], strides = [1, 1]} : vector<4x384xf32> to vector<4x128xf32>
    %138 = arith.truncf %137 : vector<4x128xf32> to vector<4x128xbf16>
    %c172 = arith.constant 172 : index
    %c0_46 = arith.constant 0 : index
    %139 = vector.load %arg6[%c172, %c0_46] : memref<256x128xbf16, #tpu.memory_space<vmem>>, vector<4x128xbf16>
    tpu.vector_store %arg6[%c172, %c0_46], %138 {strides = array<i32>} : memref<256x128xbf16, #tpu.memory_space<vmem>>, vector<4x128xbf16>,
    %140 = vector.extract_strided_slice %7 {offsets = [0, 134], sizes = [4, 128], strides = [1, 1]} : vector<4x384xf32> to vector<4x128xf32>
    %141 = arith.truncf %140 : vector<4x128xf32> to vector<4x128xbf16>
    %c176 = arith.constant 176 : index
    %c0_47 = arith.constant 0 : index
    %142 = vector.load %arg6[%c176, %c0_47] : memref<256x128xbf16, #tpu.memory_space<vmem>>, vector<4x128xbf16>
    tpu.vector_store %arg6[%c176, %c0_47], %141 {strides = array<i32>} : memref<256x128xbf16, #tpu.memory_space<vmem>>, vector<4x128xbf16>,
    %143 = vector.extract_strided_slice %7 {offsets = [0, 135], sizes = [4, 128], strides = [1, 1]} : vector<4x384xf32> to vector<4x128xf32>
    %144 = arith.truncf %143 : vector<4x128xf32> to vector<4x128xbf16>
    %c180 = arith.constant 180 : index
    %c0_48 = arith.constant 0 : index
    %145 = vector.load %arg6[%c180, %c0_48] : memref<256x128xbf16, #tpu.memory_space<vmem>>, vector<4x128xbf16>
    tpu.vector_store %arg6[%c180, %c0_48], %144 {strides = array<i32>} : memref<256x128xbf16, #tpu.memory_space<vmem>>, vector<4x128xbf16>,
    %146 = vector.extract_strided_slice %7 {offsets = [0, 136], sizes = [4, 128], strides = [1, 1]} : vector<4x384xf32> to vector<4x128xf32>
    %147 = arith.truncf %146 : vector<4x128xf32> to vector<4x128xbf16>
    %c184 = arith.constant 184 : index
    %c0_49 = arith.constant 0 : index
    %148 = vector.load %arg6[%c184, %c0_49] : memref<256x128xbf16, #tpu.memory_space<vmem>>, vector<4x128xbf16>
    tpu.vector_store %arg6[%c184, %c0_49], %147 {strides = array<i32>} : memref<256x128xbf16, #tpu.memory_space<vmem>>, vector<4x128xbf16>,
    %149 = vector.extract_strided_slice %7 {offsets = [0, 137], sizes = [4, 128], strides = [1, 1]} : vector<4x384xf32> to vector<4x128xf32>
    %150 = arith.truncf %149 : vector<4x128xf32> to vector<4x128xbf16>
    %c188 = arith.constant 188 : index
    %c0_50 = arith.constant 0 : index
    %151 = vector.load %arg6[%c188, %c0_50] : memref<256x128xbf16, #tpu.memory_space<vmem>>, vector<4x128xbf16>
    tpu.vector_store %arg6[%c188, %c0_50], %150 {strides = array<i32>} : memref<256x128xbf16, #tpu.memory_space<vmem>>, vector<4x128xbf16>,
    %152 = vector.extract_strided_slice %7 {offsets = [0, 138], sizes = [4, 128], strides = [1, 1]} : vector<4x384xf32> to vector<4x128xf32>
    %153 = arith.truncf %152 : vector<4x128xf32> to vector<4x128xbf16>
    %c192 = arith.constant 192 : index
    %c0_51 = arith.constant 0 : index
    %154 = vector.load %arg6[%c192, %c0_51] : memref<256x128xbf16, #tpu.memory_space<vmem>>, vector<4x128xbf16>
    tpu.vector_store %arg6[%c192, %c0_51], %153 {strides = array<i32>} : memref<256x128xbf16, #tpu.memory_space<vmem>>, vector<4x128xbf16>,
    %cst = arith.constant 0.000000e+00 : bf16
    %155 = vector.broadcast %cst : bf16 to vector<60x128xbf16>
    %c196 = arith.constant 196 : index
    %c0_52 = arith.constant 0 : index
    %156 = vector.load %arg6[%c196, %c0_52] : memref<256x128xbf16, #tpu.memory_space<vmem>>, vector<60x128xbf16>
    tpu.vector_store %arg6[%c196, %c0_52], %155 {strides = array<i32>} : memref<256x128xbf16, #tpu.memory_space<vmem>>, vector<60x128xbf16>,
    %c0_53 = arith.constant 0 : index
    %c0_54 = arith.constant 0 : index
    %157 = vector.load %arg4[%c0_53, %c0_54] : memref<64x256xbf16, #tpu.memory_space<vmem>>, vector<64x256xbf16>
    %c0_55 = arith.constant 0 : index
    %c0_56 = arith.constant 0 : index
    %158 = vector.load %arg6[%c0_55, %c0_56] : memref<256x128xbf16, #tpu.memory_space<vmem>>, vector<256x128xbf16>
    %cst_57 = arith.constant dense<0.000000e+00> : vector<64x128xf32>
    %159 = tpu.matmul %157, %158, %cst_57 {dimension_numbers = #tpu.dot_dimension_numbers<[1], [0], [0], [1], [0, 0, 1, 1], [], []>} : vector<64x256xbf16>, vector<256x128xbf16>, vector<64x128xf32> -> vector<64x128xf32>
    %c0_58 = arith.constant 0 : index
    %c0_59 = arith.constant 0 : index
    %160 = vector.load %arg2[%c0_58, %c0_59] : memref<1x128xf32, #tpu.memory_space<vmem>>, vector<1x128xf32>
    %161 = vector.broadcast %160 : vector<1x128xf32> to vector<64x128xf32>
    %162 = arith.mulf %159, %161 : vector<64x128xf32>
    %c0_60 = arith.constant 0 : index
    %c0_61 = arith.constant 0 : index
    %163 = vector.load %arg7[%c0_60, %c0_61] : memref<64x1xf32, #tpu.memory_space<vmem>>, vector<64x1xf32>
    %cst_62 = arith.constant dense<0.000000e+00> : vector<64xf32>
    %164 = vector.multi_reduction <add>, %162, %cst_62 [1] : vector<64x128xf32> to vector<64xf32>
    %165 = vector.shape_cast %164 : vector<64xf32> to vector<64x1xf32>
    %166 = arith.addf %163, %165 : vector<64x1xf32>
    %c0_63 = arith.constant 0 : index
    %c0_64 = arith.constant 0 : index
    %167 = vector.load %arg7[%c0_63, %c0_64] : memref<64x1xf32, #tpu.memory_space<vmem>>, vector<64x1xf32>
    tpu.vector_store %arg7[%c0_63, %c0_64], %166 {strides = array<i32>} : memref<64x1xf32, #tpu.memory_space<vmem>>, vector<64x1xf32>,
    %c0_65 = arith.constant 0 : index
    %c0_66 = arith.constant 0 : index
    %168 = vector.load %arg8[%c0_65, %c0_66] : memref<64x1xf32, #tpu.memory_space<vmem>>, vector<64x1xf32>
    %169 = arith.mulf %162, %159 : vector<64x128xf32>
    %cst_67 = arith.constant dense<0.000000e+00> : vector<64xf32>
    %170 = vector.multi_reduction <add>, %169, %cst_67 [1] : vector<64x128xf32> to vector<64xf32>
    %171 = vector.shape_cast %170 : vector<64xf32> to vector<64x1xf32>
    %172 = arith.addf %168, %171 : vector<64x1xf32>
    %c0_68 = arith.constant 0 : index
    %c0_69 = arith.constant 0 : index
    %173 = vector.load %arg8[%c0_68, %c0_69] : memref<64x1xf32, #tpu.memory_space<vmem>>, vector<64x1xf32>
    tpu.vector_store %arg8[%c0_68, %c0_69], %172 {strides = array<i32>} : memref<64x1xf32, #tpu.memory_space<vmem>>, vector<64x1xf32>,
    %c0_70 = arith.constant 0 : index
    %c0_71 = arith.constant 0 : index
    %174 = arith.index_cast %1 : i32 to index
    %175 = vector.load %arg5[%c0_70, %c0_71, %174] : memref<1x64x384xf32, #tpu.memory_space<vmem>>, vector<1x64x128xf32>
    %176 = vector.shape_cast %175 : vector<1x64x128xf32> to vector<64x128xf32>
    %177 = vector.shape_cast %159 : vector<64x128xf32> to vector<1x64x128xf32>
    tpu.vector_store %arg5[%c0_70, %c0_71, %174], %177 {strides = array<i32>} : memref<1x64x384xf32, #tpu.memory_space<vmem>>, vector<1x64x128xf32>,
    %c2_i32 = arith.constant 2 : i32
    %178 = arith.cmpi eq, %arg1, %c2_i32 : i32
    %179 = arith.extui %178 : i1 to i32
    %c0_i32_72 = arith.constant 0 : i32
    %180 = arith.cmpi ne, %179, %c0_i32_72 : i32
    scf.if %180 {
      %c0_73 = arith.constant 0 : index
      %c0_74 = arith.constant 0 : index
      %181 = vector.load %arg7[%c0_73, %c0_74] : memref<64x1xf32, #tpu.memory_space<vmem>>, vector<64x1xf32>
      %cst_75 = arith.constant 3.906250e-03 : f32
      %182 = vector.broadcast %cst_75 : f32 to vector<64x1xf32>
      %183 = arith.mulf %181, %182 : vector<64x1xf32>
      %c0_76 = arith.constant 0 : index
      %c0_77 = arith.constant 0 : index
      %184 = vector.load %arg8[%c0_76, %c0_77] : memref<64x1xf32, #tpu.memory_space<vmem>>, vector<64x1xf32>
      %cst_78 = arith.constant 3.906250e-03 : f32
      %185 = vector.broadcast %cst_78 : f32 to vector<64x1xf32>
      %186 = arith.mulf %184, %185 : vector<64x1xf32>
      %187 = arith.mulf %183, %183 : vector<64x1xf32>
      %188 = arith.subf %186, %187 : vector<64x1xf32>
      %cst_79 = arith.constant 9.99999974E-6 : f32
      %189 = vector.broadcast %cst_79 : f32 to vector<64x1xf32>
      %190 = arith.addf %188, %189 : vector<64x1xf32>
      %191 = math.rsqrt %190 : vector<64x1xf32>
      %c0_80 = arith.constant 0 : index
      %c0_81 = arith.constant 0 : index
      %c0_82 = arith.constant 0 : index
      %192 = vector.load %arg5[%c0_80, %c0_81, %c0_82] : memref<1x64x384xf32, #tpu.memory_space<vmem>>, vector<1x64x384xf32>
      %193 = vector.shape_cast %192 : vector<1x64x384xf32> to vector<64x384xf32>
      %194 = vector.broadcast %191 : vector<64x1xf32> to vector<64x384xf32>
      %195 = arith.mulf %193, %194 : vector<64x384xf32>
      %196 = arith.mulf %183, %191 : vector<64x1xf32>
      %197 = vector.broadcast %196 : vector<64x1xf32> to vector<64x384xf32>
      %198 = arith.subf %195, %197 : vector<64x384xf32>
      %cst_83 = arith.constant 0.000000e+00 : f32
      %199 = vector.broadcast %cst_83 : f32 to vector<64x384xf32>
      %200 = arith.maximumf %198, %199 : vector<64x384xf32>
      %c0_84 = arith.constant 0 : index
      %c0_85 = arith.constant 0 : index
      %c0_86 = arith.constant 0 : index
      %201 = vector.load %arg5[%c0_84, %c0_85, %c0_86] : memref<1x64x384xf32, #tpu.memory_space<vmem>>, vector<1x64x384xf32>
      %202 = vector.shape_cast %201 : vector<1x64x384xf32> to vector<64x384xf32>
      %203 = vector.shape_cast %200 : vector<64x384xf32> to vector<1x64x384xf32>
      tpu.vector_store %arg5[%c0_84, %c0_85, %c0_86], %203 {strides = array<i32>} : memref<1x64x384xf32, #tpu.memory_space<vmem>>, vector<1x64x384xf32>,
    } else {
    }
    return
  }
  func.func @transform_0(%arg0: i32, %arg1: i32) -> (i32, i32) {
    %c0_i32 = arith.constant 0 : i32
    %c0_i32_0 = arith.constant 0 : i32
    return %c0_i32, %arg1 : i32, i32
  }
  func.func @transform_1(%arg0: i32, %arg1: i32) -> (i32, i32, i32) {
    %c0_i32 = arith.constant 0 : i32
    %c0_i32_0 = arith.constant 0 : i32
    %c0_i32_1 = arith.constant 0 : i32
    return %arg0, %c0_i32, %c0_i32_0 : i32, i32, i32
  }
  func.func @transform_2(%arg0: i32, %arg1: i32) -> (i32, i32) {
    %c0_i32 = arith.constant 0 : i32
    %c0_i32_0 = arith.constant 0 : i32
    %c0_i32_1 = arith.constant 0 : i32
    return %c0_i32, %c0_i32_0 : i32, i32
  }
  func.func @transform_3(%arg0: i32, %arg1: i32) -> (i32, i32, i32) {
    %c0_i32 = arith.constant 0 : i32
    %c0_i32_0 = arith.constant 0 : i32
    %c0_i32_1 = arith.constant 0 : i32
    return %arg0, %c0_i32, %c0_i32_0 : i32, i32, i32
  }
}

</mosaic_0001>

<bundles_post_ra>
// kernel: tpu_custom_call.1
= control target key start
LH: loop header
LB: loop body
LE: loop exit
PB: predicated region body
PF: predicated region fallthrough
CT: control target
= control target key end

     0   :  { %s2568_s0 = inlined_call_operand.hbm [shape: f32[1,384], index: 0, kind: input, shape index: {}]   ;;  %s2569_s1 = inlined_call_operand.hbm [shape: f32[2,4,640], index: 1, kind: input, shape index: {}]   ;;  %s2570_s2 = inlined_call_operand.hbm [shape: bf16[64,256], index: 2, kind: input, shape index: {}]   ;;  %s2571_s3 = inlined_call_operand.hbm [shape: f32[2,64,384], index: 3, kind: output, shape index: {}]  }
   0x1   :  { %2582 = sst [smem:[#allocation20_spill]] %s2568_s0 }
   0x2   :  { %2583 = sst [smem:[#allocation21_spill]] %s2570_s2 }
   0x3   :  { %8 = vsyncpa [#allocation6], 0 }
   0x4   :  { %10 = vsyncpa [#allocation6 + $0x1], 0 }
   0x5   :  { %11 = vsyncpa [#allocation9], 0 }
   0x6   :  { %13 = vsyncpa [#allocation9 + $0x1], 0 }
   0x7   :  { %14 = vsyncpa [#allocation7], 0 }
   0x8   :  { %16 = vsyncpa [#allocation7 + $0x1], 0  ;;  %s1970_s12 = smov 0   ;;  %s1972_s13 = smov 0  }
   0x9   :  { %s1974_s14 = smov 0   ;;  %s1976_s15 = smov 0  }
   0xa   :  { %s1978_s16 = smov 0   ;;  %s1980_s17 = smov 0  }
   0xb   :  { %s1982_s18 = smov 0   ;;  %s1984_s19 = smov 0  }
   0xc   :  { %s1986_s20 = smov 0   ;;  %s1988_s21 = smov 0  }
   0xd   :  { %s1990_s22 = smov 0  }
   0xe LB: > { %2584 = sst [smem:[#allocation16_spill]] %s1884_s20  ;;  %s2026_s23 = sadd.s32 4294967295, %s1892_s22   ;;  %s1892_s22 = sphi %s1990_s22, %s22_s22   ;;  %s1888_s21 = sphi %s1988_s21, %s2612_s21   ;;  %s1884_s20 = sphi %s1986_s20, %s2611_s20   ;;  %s1880_s19 = sphi %s1984_s19, %s2610_s19   ;;  %s1876_s18 = sphi %s1982_s18, %s2609_s18   ;;  %s1872_s17 = sphi %s1980_s17, %s2618_s17   ;;  %s1868_s16 = sphi %s1978_s16, %s2617_s16   ;;  %s1864_s15 = sphi %s1976_s15, %s2616_s15   ;;  %s1860_s14 = sphi %s1974_s14, %s2615_s14   ;;  %s1856_s13 = sphi %s1972_s13, %s2614_s13   ;;  %s1852_s12 = sphi %s1970_s12, %s2613_s12  }
   0xf   : > { %2585 = sst [smem:[#allocation17_spill]] %s1888_s21  ;;  %p1353_p0 = scmp.ge.s32.totalorder %s1892_s22, 1 }
  0x10   : > { %p2572_p1 = scmp.eq.s32.totalorder %s2026_s23, 0  ;;  %p138_p2 = scmp.lt.s32.totalorder %s1892_s22, 7 }
  0x11   : > { %s1894_s25 = smov [#allocation10]   ;;  %s2588_s2 = sld [smem:[#allocation21_spill]] }
  0x12   : > { %p2031_p3 = pnand %p1353_p0, %p138_p2  ;;  %s150_s26 = sshll.u32 %s1894_s25, 4  ;;  %s151_s26 = int_to_ptr.vmem [resolvable:$true] %s150_s26 }
  0x14   : > { %s2586_s24 = scalar_select %p2031_p3, 1, 0 }
  0x15   : > { %p1448_p4 = pneg %p2031_p3 }
  0x17   : > { %p2039_p5 = pnand %p1448_p4, %p2572_p1  ;;  %s1674_s30 = scalar_lea.hbm %s2588_s2, 1024 }
  0x18   : > { %p1675_p6 = scmp.ne.s32.totalorder %s2588_s2, %s1674_s30  ;;  %p1681_p10 = scmp.lt.u32.totalorder %s1674_s30, %s2588_s2 }
  0x19   : > { %p1676_p7 = pneg %p2039_p5 }
  0x1b   : > { %p1677_p8 = pnand %p1676_p7, %p1675_p6 }
  0x1d   : > { %p1678_p9 = pneg %p1677_p8 }
  0x1f   : > { %p1683_p11 = pnand %p1681_p10, %p1678_p9 }
  0x21   : > { %1686 = shalt.err (!%p1683_p11)
}
  0x22   : > { %s1687_s8 = scalar_lea.vmem %s151_s26, 1024  ;;  %p1695_p2 = scmp.lt.s32.totalorder %s151_s26, %s151_s26 }
  0x23   : > { %p1688_p12 = scmp.ne.s32.totalorder %s151_s26, %s1687_s8  ;;  %p1696_p4 = scmp.lt.s32.totalorder %s1687_s8, %s1687_s8 }
  0x25   : > { %p1690_p13 = pnand %p1688_p12, %p1676_p7  ;;  %p1697_p1 = por %p1696_p4, %p1695_p2 }
  0x27   : > { %p1691_p0 = pneg %p1690_p13 }
  0x29   : > { %p1698_p3 = pnand %p1697_p1, %p1691_p0 }
  0x2b   : > { %1701 = shalt.err (!%p1698_p3)
}
  0x2c   : > { %s1895_s9 = smov 128   ;;  %s1896_s10 = smov 8  }
  0x2d   : > { %1451 = dma.hbm_to_vmem [thread:$0]  (!%p2039_p5), %s2588_s2, 1024, %s151_s26, [#allocation9], %s1895_s9, %s1895_s9, %s1896_s10  }
  0x2e   : > { %s31_s28 = sadd.s32 1, %s1884_s20  ;;  %s41_s29 = sadd.s32 1, %s1872_s17 }
  0x2f   : > { %p2061_p1 = scmp.ge.s32.totalorder %s31_s28, 3  ;;  %p48_p3 = scmp.ne.s32.totalorder %s1872_s17, %s1868_s16 }
  0x30   : > { %p2575_p6 = scmp.eq.s32.totalorder %s1892_s22, 0  ;;  %p54_p7 = scmp.ne.s32.totalorder %s1868_s16, %s1864_s15 }
  0x31   : > { %s2620_s28 = smov (%p2061_p1, %s31_s28), 0  ;;  %p2591_p9 = scmp.eq.s32.totalorder %s2026_s23, 0 }
  0x32   : > { %2590 = sst [smem:[#allocation18_spill]] %s2620_s28  ;;  %p50_p8 = por %p2575_p6, %p48_p3 }
  0x33   : > { %p2078_p10 = por %p2591_p9, %p54_p7  ;;  %s38_s27 = ssub.s32 %s1884_s20, %s2620_s28 }
  0x34   : > { %p2574_p5 = scmp.lt.s32.totalorder %s1892_s22, 6  ;;  %p39_p11 = scmp.eq.s32.totalorder %s38_s27, 0 }
  0x35   : > { %s2592_s26 = scalar_select %p2078_p10, 1, 0 }
  0x36   : > { %s164_s4 = sand.u32 1, %s1872_s17   ;;  %s1356_s6 = sshll.u32 %s1884_s20, 4 }
  0x37   : > { %s2087_s5 = scalar_select %p39_p11, %s1872_s17, %s41_s29  }
  0x38   : > { %s167_s7 = scalar_lea.vmem [#allocation5], %s164_s4  ;;  %s2593_s0 = sld [smem:[#allocation20_spill]] }
  0x39   : > { %s174_s15 = sshll.u32 %s167_s7, 4  ;;  %p2099_p12 = pnand %p2574_p5, %p50_p8  ;;  %s2095_s15 = int_to_ptr.vmem [resolvable:$true] %s174_s15 }
  0x3a   : > { %s165_s25 = scalar_lea.sflag [#allocation6], %s164_s4 }
  0x3b   : > { %p1704_p0 = pneg %p2099_p12 }
  0x3e   : > { %s2093_s10 = scalar_lea.hbm %s2593_s0, %s1356_s6  ;;  %s1707_s7 = scalar_lea.hbm %s2593_s0, 48 }
  0x3f   : > { %s1702_s29 = scalar_lea.hbm %s2093_s10, 16  ;;  %p1708_p3 = scmp.lt.u32.totalorder %s2093_s10, %s2593_s0 }
  0x40   : > { %p1703_p13 = scmp.ne.s32.totalorder %s2093_s10, %s1702_s29  ;;  %p1709_p7 = scmp.lt.u32.totalorder %s1707_s7, %s1702_s29 }
  0x41   : > { %p1711_p9 = scmp.lt.u32.totalorder %s1702_s29, %s2093_s10 }
  0x42   : > { %p1705_p2 = pnand %p1704_p0, %p1703_p13  ;;  %p1710_p8 = por %p1709_p7, %p1708_p3 }
  0x44   : > { %p1706_p4 = pneg %p1705_p2  ;;  %p1712_p11 = por %p1711_p9, %p1710_p8 }
  0x46   : > { %p1713_p5 = pnand %p1712_p11, %p1706_p4 }
  0x48   : > { %1716 = shalt.err (!%p1713_p5)
}
  0x49   : > { %s1717_s4 = scalar_lea.vmem %s2095_s15, 16  ;;  %s1897_s27 = smov [#allocation5]  }
  0x4a   : > { %p1718_p13 = scmp.ne.s32.totalorder %s2095_s15, %s1717_s4  ;;  %s1722_s6 = sshll.u32 %s1897_s27, 4  ;;  %s1723_s6 = int_to_ptr.vmem [resolvable:$false] %s1722_s6 }
  0x4b   : > { %s1724_s8 = scalar_lea.vmem %s1723_s6, 32  ;;  %p1725_p10 = scmp.lt.s32.totalorder %s2095_s15, %s1723_s6 }
  0x4c   : > { %p1720_p2 = pnand %p1718_p13, %p1704_p0  ;;  %p1726_p3 = scmp.lt.s32.totalorder %s1724_s8, %s1717_s4 }
  0x4e   : > { %p1721_p6 = pneg %p1720_p2  ;;  %p1727_p7 = por %p1726_p3, %p1725_p10 }
  0x50   : > { %p1728_p8 = pnand %p1727_p7, %p1721_p6 }
  0x52   : > { %1731 = shalt.err (!%p1728_p8)
}
  0x53   : > { %1455 = dma.hbm_to_vmem [thread:$0]  (!%p2099_p12), %s2093_s10, 16, %s2095_s15, %s165_s25  }
  0x54   : > { %p125_p6 = scmp.eq.s32.totalorder %s2026_s23, 5  ;;  %s34_s29 = sadd.s32 1, %s1888_s21 }
  0x55   : > { %s2622_s29 = smov (!%p2061_p1, %s34_s29), %s1888_s21  ;;  %s1352_s11 = sadd.s32 4294967294, %s1892_s22  }
  0x56   : > { %p74_p10 = scmp.ne.s32.totalorder %s1860_s14, %s1856_s13  ;;  %p36_p5 = scmp.ge.s32.totalorder %s2622_s29, 2 }
  0x57   : > { %p80_p0 = scmp.ne.s32.totalorder %s1856_s13, %s1852_s12  ;;  %s67_s7 = sadd.s32 1, %s1860_s14 }
  0x58   : > { %p2139_p4 = por %p125_p6, %p74_p10  ;;  %s2624_s29 = smov (%p36_p5, %s2622_s29), 0 }
  0x59   : > { %2596 = sst [smem:[#allocation19_spill]] %s2624_s29  ;;  %p2597_p12 = scmp.eq.s32.totalorder %s2026_s23, 0 }
  0x5a   : > { %s2595_s9 = scalar_select %p2139_p4, 1, 0 }
  0x5b   : > { %p2147_p9 = por %p80_p0, %p2597_p12  ;;  %p131_p1 = scmp.eq.s32.totalorder %s1352_s11, 5 }
  0x5c   : > { %s64_s15 = ssub.s32 %s1888_s21, %s2624_s29  ;;  %p2599_p11 = scmp.eq.s32.totalorder %s1892_s22, 0 }
  0x5d   : > { %p65_p2 = scmp.eq.s32.totalorder %s64_s15, 0  ;;  %p2155_p3 = por %p131_p1, %p80_p0 }
  0x5e   : > { %p76_p13 = por %p74_p10, %p2599_p11  ;;  %s181_s25 = sand.u32 1, %s1892_s22  }
  0x5f   : > { %s2600_s10 = scalar_select %p2155_p3, 1, 0 }
  0x60   : > { %s183_s4 = sand.u32 1, %s1860_s14   ;;  %p2601_p7 = scmp.lt.s32.totalorder %s1892_s22, 6 }
  0x61   : > { %s2162_s27 = scalar_select %p65_p2, %s1860_s14, %s67_s7  }
  0x62   : > { %s1433_s6 = smul.u32 20, %s183_s4  ;;  %p2166_p8 = pnand %p2601_p7, %p76_p13 }
  0x63   : > { %s1434_s11 = smul.u32 320, %s1888_s21  ;;  %s182_s4 = scalar_lea.sflag [#allocation9], %s181_s25 }
  0x64   : > { %s185_s7 = scalar_lea.vmem [#allocation8], %s1433_s6  ;;  %p1734_p10 = pneg %p2166_p8 }
  0x65   : > { %s2174_s15 = scalar_lea.hbm %s2569_s1, %s1434_s11  ;;  %s193_s29 = sshll.u32 %s185_s7, 4  ;;  %s2176_s29 = int_to_ptr.vmem [resolvable:$true] %s193_s29 }
  0x66   : > { %s1732_s28 = scalar_lea.hbm %s2174_s15, 320  ;;  %s1737_s11 = scalar_lea.hbm %s2569_s1, 640 }
  0x67   : > { %p1733_p6 = scmp.ne.s32.totalorder %s2174_s15, %s1732_s28  ;;  %p1738_p12 = scmp.lt.u32.totalorder %s2174_s15, %s2569_s1 }
  0x68   : > { %p1739_p1 = scmp.lt.u32.totalorder %s1737_s11, %s1732_s28  ;;  %p1741_p13 = scmp.lt.u32.totalorder %s1732_s28, %s2174_s15 }
  0x69   : > { %p1735_p5 = pnand %p1734_p10, %p1733_p6 }
  0x6a   : > { %p1740_p11 = por %p1739_p1, %p1738_p12 }
  0x6b   : > { %p1736_p0 = pneg %p1735_p5 }
  0x6c   : > { %p1742_p2 = por %p1741_p13, %p1740_p11 }
  0x6e   : > { %p1743_p7 = pnand %p1742_p2, %p1736_p0 }
  0x70   : > { %1746 = shalt.err (!%p1743_p7)
}
  0x71   : > { %s1747_s25 = scalar_lea.vmem %s2176_s29, 320  ;;  %s1898_s6 = smov [#allocation8]  }
  0x72   : > { %p1748_p6 = scmp.ne.s32.totalorder %s2176_s29, %s1747_s25  ;;  %s1752_s7 = sshll.u32 %s1898_s6, 4  ;;  %s1753_s7 = int_to_ptr.vmem [resolvable:$false] %s1752_s7 }
  0x73   : > { %s1754_s20 = scalar_lea.vmem %s1753_s7, 640  ;;  %p1755_p4 = scmp.lt.s32.totalorder %s2176_s29, %s1753_s7 }
  0x74   : > { %p1750_p5 = pnand %p1748_p6, %p1734_p10  ;;  %p1756_p12 = scmp.lt.s32.totalorder %s1754_s20, %s1747_s25 }
  0x76   : > { %p1751_p3 = pneg %p1750_p5  ;;  %p1757_p1 = por %p1756_p12, %p1755_p4 }
  0x78   : > { %p1758_p11 = pnand %p1757_p1, %p1751_p3 }
  0x7a   : > { %1761 = shalt.err (!%p1758_p11)
}
  0x7b   : > { %1458 = dma.hbm_to_vmem [thread:$0]  (!%p2166_p8), %s2174_s15, 320, %s2176_s29, %s182_s4  }
  0x7c   : > { %p2603_p0 = scmp.ne.s32.totalorder %s2586_s24, 0 }
  0x7d   : > { %s204_s21 = sand.u32 (!%p2603_p0), 1, %s1868_s16   ;;  %p2604_p10 = scmp.ne.s32.totalorder (!%p2603_p0), %s2592_s26, 0 }
  0x7e   : > { %202 = sbr.rel (%p2603_p0) target bundleno = 1061 (0x425), region = 32  ;;  %s205_s28 = scalar_lea.sflag (!%p2603_p0), [#allocation6], %s204_s21 }
  0x7f   : > { %s2206_s0 = scalar_lea.vmem (!%p2603_p0), [#allocation5], %s204_s21 }
  0x85   : > { %1835 = dma.done.wait (%p2604_p10), %s205_s28, 16  }
  0x86   : > { %1837 = vsyncadd (%p2604_p10), %s205_s28, 4294967280  ;;  %s212_s8 = sand.u32 1, %s2026_s23   ;;  %s2214_s2 = sand.u32 1, %s1856_s13  }
  0x87   : > { %s1435_s24 = smul.u32 20, %s2214_s2  ;;  %s213_s29 = scalar_lea.sflag [#allocation9], %s212_s8 }
  0x89   : > { %s2217_s15 = scalar_lea.vmem [#allocation8], %s1435_s24 }
  0x8a   : > { %1839 = dma.done.wait (%p2147_p9), %s213_s29, 320  }
  0x8b   : > { %1841 = vsyncadd (%p2147_p9), %s213_s29, 4294966976  ;;  %p2605_p4 = scmp.eq.s32.totalorder %s2026_s23, 0 }
  0x8d   : > { %1843 = dma.done.wait (%p2605_p4), [#allocation9], 1024   ;;  %p2606_p3 = pmov %p2605_p4 }
  0x8e   : > { %s1436_s26 = smul.u32 192, %s2214_s2  ;;  %s1360_s4 = sshll.u32 %s1876_s18, 7 }
  0x8f   : > { %1845 = vsyncadd (%p2606_p3), [#allocation9], 4294966272  ;;  %p1361_p8 = scmp.ne.s32.totalorder %s1876_s18, 0 }
  0x90   : > { %s2229_s11 = scalar_lea.vmem [#allocation11], %s1436_s26  ;;  %vm253_vm0 = vcmask (!%p1361_p8), 7168   ;;  %v1899_v0 = vmov (!%p1361_p8), 0.0  }
  0x91   : > { %252 = sbr.rel (%p1361_p8) target bundleno = 153 (0x99), region = 48  ;;  %254 = vst.msk [vmem:[#allocation3] sm:$0xff] (!%p1361_p8), %vm253_vm0, %v1899_v0  ;;  %255 = vst.msk [vmem:[#allocation3 + $0x8] sm:$0xff] (!%p1361_p8), %vm253_vm0, %v1899_v0 }
  0x92   : > { %256 = vst.msk [vmem:[#allocation3 + $0x10] sm:$0xff] (!%p1361_p8), %vm253_vm0, %v1899_v0  ;;  %257 = vst.msk [vmem:[#allocation3 + $0x18] sm:$0xff] (!%p1361_p8), %vm253_vm0, %v1899_v0 }
  0x93   : > { %258 = vst.msk [vmem:[#allocation3 + $0x20] sm:$0xff] (!%p1361_p8), %vm253_vm0, %v1899_v0  ;;  %259 = vst.msk [vmem:[#allocation3 + $0x28] sm:$0xff] (!%p1361_p8), %vm253_vm0, %v1899_v0 }
  0x94   : > { %260 = vst.msk [vmem:[#allocation3 + $0x30] sm:$0xff] (!%p1361_p8), %vm253_vm0, %v1899_v0  ;;  %261 = vst.msk [vmem:[#allocation3 + $0x38] sm:$0xff] (!%p1361_p8), %vm253_vm0, %v1899_v0 }
  0x95   : > { %262 = vst.msk [vmem:[#allocation4] sm:$0xff] (!%p1361_p8), %vm253_vm0, %v1899_v0  ;;  %263 = vst.msk [vmem:[#allocation4 + $0x8] sm:$0xff] (!%p1361_p8), %vm253_vm0, %v1899_v0 }
  0x96   : > { %264 = vst.msk [vmem:[#allocation4 + $0x10] sm:$0xff] (!%p1361_p8), %vm253_vm0, %v1899_v0  ;;  %265 = vst.msk [vmem:[#allocation4 + $0x18] sm:$0xff] (!%p1361_p8), %vm253_vm0, %v1899_v0 }
  0x97   : > { %266 = vst.msk [vmem:[#allocation4 + $0x20] sm:$0xff] (!%p1361_p8), %vm253_vm0, %v1899_v0  ;;  %267 = vst.msk [vmem:[#allocation4 + $0x28] sm:$0xff] (!%p1361_p8), %vm253_vm0, %v1899_v0 }
  0x98   : > { %268 = vst.msk [vmem:[#allocation4 + $0x30] sm:$0xff] %vm253_vm0, %v1899_v0  ;;  %269 = vst.msk [vmem:[#allocation4 + $0x38] sm:$0xff] %vm253_vm0, %v1899_v0 }
  0x99 PF: > { %s2248_s23 = sshra.s32 %s1360_s4, 7  ;;  %s1900_s6 = smov 36   ;;  %v1927_v13 = vmov 0   ;;  %vm542_vm1 = vcmask 293888   ;;  %vm550_vm2 = vcmask 285696   ;;  %vm558_vm3 = vcmask 277504  }
  0x9a   : > { %s1362_s30 = sshll.u32 %s2248_s23, 2  ;;  %s1901_s7 = smov 35   ;;  %697 = vst [vmem:[#allocation2 + $0x60] sm:$0xfc] %v1927_v13  ;;  %vm566_vm4 = vcmask 146432   ;;  %vm290_vm5 = vcmask 1039360  }
  0x9b   : > { %s273_s25 = scalar_lea.vmem %s2217_s15, %s1362_s30 [#allocation8]  ;;  %s1902_s20 = smov 34   ;;  %vm300_vm6 = vcmask 1031168   ;;  %vm310_vm7 = vcmask 1022976   ;;  %vm574_vm8 = vcmask 138240   ;;  %vm582_vm9 = vcmask 130048  }
  0x9c   : > { %v274_v1 = vld [vmem:[%s273_s25] sm:$0xff]  ;;  %v275_v7 = vld [vmem:[%s273_s25 + $0x8] sm:$0xf]  ;;  %s1903_s21 = smov 18   ;;  %s1904_s28 = smov 127   ;;  %vm590_vm10 = vcmask 121856  }
  0x9d   : > { %v2252_v2 = vpack.c.bf16 %v274_v1, %v274_v1  ;;  %v279_v3 = vcombine.high %v274_v1, %v274_v1  ;;  %s1905_s8 = smov 126   ;;  %s1906_s24 = smov 125   ;;  %vm598_vm11 = vcmask 113664   ;;  %vm318_vm12 = vcmask 1014784  }
  0x9e   : > { %s1907_s29 = smov 17   ;;  %s1908_s15 = smov 16   ;;  %vm326_vm13 = vcmask 1006592   ;;  %vm334_vm14 = vcmask 998400   ;;  %vm342_vm15 = vcmask 867328   ;;  %vm606_vm0 = vcmask 105472  }
  0x9f   : > { %538 = vrot.lane.b32.xlu0 %v2252_v2, %s1900_s6  ;;  %277 = vst [vmem:[#allocation2] sm:$0x3] %v2252_v2  ;;  %v2257_v4 = vrot.slane %v2252_v2, 6  ;;  %v2259_v5 = vpack.c.bf16 %v279_v3, %v279_v3  ;;  %v2265_v8 = vpack.i.bf16 %v275_v7, %v279_v3  ;;  %v2269_v9 = vrot.slane %v2252_v2, 4  ;;  %s1909_s26 = smov 15   ;;  %s1910_s4 = smov 14  }
  0xa0   : > { %v2277_v11 = vrot.slane %v2252_v2, 2  ;;  %s1911_s30 = smov 124   ;;  %s1912_s25 = smov 123  }
  0xa1   : > { %546 = vrot.lane.b32.xlu1 %v2257_v4, %s1901_s7  ;;  %v2263_v6 = vrot.slane %v2259_v5, 6  ;;  %v2273_v10 = vrot.slane %v2259_v5, 4  ;;  %v2281_v12 = vrot.slane %v2259_v5, 2  ;;  %p1373_p9 = scmp.ne.s32.totalorder %s1876_s18, 2 }
  0xa3   : > { %540 = vrot.lane.b32.xlu0 %v2259_v5, %s1900_s6  ;;  %s1913_s6 = smov 122  }
  0xa5   : > { %548 = vrot.lane.b32.xlu1 %v2263_v6, %s1901_s7  ;;  %s1914_s7 = smov 106  }
  0xa7   : > { %554 = vrot.lane.b32.xlu0 %v2269_v9, %s1902_s20 }
  0xa9   : > { %556 = vrot.lane.b32.xlu1 %v2273_v10, %s1902_s20  ;;  %s1915_s20 = smov 13  }
  0xab   : > { %562 = vrot.lane.b32.xlu0 %v2277_v11, %s1903_s21 }
  0xad   : > { %564 = vrot.lane.b32.xlu1 %v2281_v12, %s1903_s21  ;;  %s1916_s21 = smov 12  }
  0xaf   : > { %286 = vrot.lane.b32.xlu0 %v2257_v4, %s1904_s28 }
  0xb1   : > { %288 = vrot.lane.b32.xlu1 %v2263_v6, %s1904_s28  ;;  %s1917_s28 = smov 121  }
  0xb3   : > { %296 = vrot.lane.b32.xlu0 %v2269_v9, %s1905_s8 }
  0xb5   : > { %298 = vrot.lane.b32.xlu1 %v2273_v10, %s1905_s8  ;;  %s1918_s8 = smov 120  }
  0xb7   : > { %306 = vrot.lane.b32.xlu0 %v2277_v11, %s1906_s24 }
  0xb9   : > { %308 = vrot.lane.b32.xlu1 %v2281_v12, %s1906_s24  ;;  %s1919_s24 = smov 119  }
  0xbb   : > { %570 = vrot.lane.b32.xlu0 %v2252_v2, %s1907_s29 }
  0xbd   : > { %572 = vrot.lane.b32.xlu1 %v2259_v5, %s1907_s29  ;;  %s1920_s29 = smov 105  }
  0xbf   : > { %578 = vrot.lane.b32.xlu0 %v2257_v4, %s1908_s15 }
  0xc1   : > { %580 = vrot.lane.b32.xlu1 %v2263_v6, %s1908_s15  ;;  %s1921_s15 = smov 104  }
  0xc3   : > { %586 = vrot.lane.b32.xlu0 %v2269_v9, %s1909_s26 }
  0xc5   : > { %588 = vrot.lane.b32.xlu1 %v2273_v10, %s1909_s26  ;;  %s1922_s26 = smov 103  }
  0xc7   : > { %594 = vrot.lane.b32.xlu0 %v2277_v11, %s1910_s4 }
  0xc9   : > { %596 = vrot.lane.b32.xlu1 %v2281_v12, %s1910_s4  ;;  %s1923_s4 = smov 102  }
  0xcb   : > { %1609 = vrot.lane.b32.xlu0 %v2265_v8, %s1911_s30 }
  0xcd   : > { %1614 = vrot.lane.b32.xlu1 %v2265_v8, %s1912_s25 }
  0xcf   : > { %314 = vrot.lane.b32.xlu0 %v2252_v2, %s1911_s30 }
  0xd1   : > { %316 = vrot.lane.b32.xlu1 %v2259_v5, %s1911_s30  ;;  %s1924_s30 = smov 101  }
  0xd3   : > { %322 = vrot.lane.b32.xlu0 %v2257_v4, %s1912_s25 }
  0xd5   : > { %324 = vrot.lane.b32.xlu1 %v2263_v6, %s1912_s25  ;;  %s1925_s25 = smov 100  }
  0xd7   : > { %330 = vrot.lane.b32.xlu0 %v2269_v9, %s1913_s6 }
  0xd9   : > { %332 = vrot.lane.b32.xlu1 %v2273_v10, %s1913_s6 }
  0xdb   : > { %338 = vrot.lane.b32.xlu0 %v2277_v11, %s1914_s7 }
  0xdd   : > { %340 = vrot.lane.b32.xlu1 %v2281_v12, %s1914_s7  ;;  %s1926_s7 = smov 84  }
  0xdf   : > { %602 = vrot.lane.b32.xlu0 %v2252_v2, %s1915_s20 }
  0xe1   : > { %604 = vrot.lane.b32.xlu1 %v2259_v5, %s1915_s20  ;;  %s1928_s20 = smov 83  }
  0xe3   : > { %610 = vrot.lane.b32.xlu0 %v2257_v4, %s1916_s21 }
  0xe5   : > { %612 = vrot.lane.b32.xlu1 %v2263_v6, %s1916_s21  ;;  %s1930_s21 = smov 82  }
  0xe7   : > { %1619 = vrot.lane.b32.xlu0 %v2265_v8, %s1917_s28  ;;  %s1931_s28 = smov 81  }
  0xe9   : > { %1624 = vrot.lane.b32.xlu1 %v2265_v8, %s1918_s8  ;;  %s1932_s8 = smov 80  }
  0xeb   : > { %1629 = vrot.lane.b32.xlu0 %v2265_v8, %s1919_s24  ;;  %s1933_s24 = smov 79  }
  0xed   : > { %346 = vrot.lane.b32.xlu1 %v2252_v2, %s1920_s29 }
  0xef   : > { %348 = vrot.lane.b32.xlu0 %v2259_v5, %s1920_s29  ;;  %s1934_s29 = smov 78  }
  0xf1   : > { %354 = vrot.lane.b32.xlu1 %v2257_v4, %s1921_s15 }
  0xf3   : > { %356 = vrot.lane.b32.xlu0 %v2263_v6, %s1921_s15  ;;  %s1935_s15 = smov 62  }
  0xf5   : > { %362 = vrot.lane.b32.xlu1 %v2269_v9, %s1922_s26 }
  0xf7   : > { %364 = vrot.lane.b32.xlu0 %v2273_v10, %s1922_s26  ;;  %s1936_s26 = smov 61  }
  0xf9   : > { %370 = vrot.lane.b32.xlu1 %v2277_v11, %s1923_s4 }
  0xfb   : > { %372 = vrot.lane.b32.xlu0 %v2281_v12, %s1923_s4  ;;  %s1937_s4 = smov 60  }
  0xfd   : > { %1634 = vrot.lane.b32.xlu1 %v2265_v8, %s1913_s6  ;;  %s1929_s6 = smov 118  }
  0xff   : > { %378 = vrot.lane.b32.xlu0 %v2252_v2, %s1924_s30 }
 0x101   : > { %380 = vrot.lane.b32.xlu1 %v2259_v5, %s1924_s30  ;;  %s1938_s30 = smov 59  }
 0x103   : > { %386 = vrot.lane.b32.xlu0 %v2257_v4, %s1925_s25 }
 0x105   : > { %388 = vrot.lane.b32.xlu1 %v2263_v6, %s1925_s25  ;;  %s1939_s25 = smov 58  }
 0x107   : > { %394 = vrot.lane.b32.xlu0 %v2269_v9, %s1926_s7 }
 0x109   : > { %396 = vrot.lane.b32.xlu1 %v2273_v10, %s1926_s7  ;;  %s1940_s7 = smov 57  }
 0x10b   : > { %402 = vrot.lane.b32.xlu0 %v2277_v11, %s1928_s20 }
 0x10d   : > { %404 = vrot.lane.b32.xlu1 %v2281_v12, %s1928_s20  ;;  %s1941_s20 = smov 56  }
 0x10f   : > { %1639 = vrot.lane.b32.xlu0 %v2265_v8, %s1929_s6  ;;  %s1942_s6 = smov 40   ;;  %v1646_v8 = vld [vmem:[#allocation10 + $0x4] ss:$8 sps:$4 sm:$0xff]  }
 0x110   : > { %797 = vmatprep.mubr.bf16.mxu0 %v1646_v8 }
 0x111   : > { %v539_v14 = vpop.permute.xlu0 %538  ;;  %410 = vrot.lane.b32.xlu1 %v2252_v2, %s1930_s21 }
 0x113   : > { %412 = vrot.lane.b32.xlu0 %v2259_v5, %s1930_s21  ;;  %v547_v15 = vpop.permute.xlu1 %546  ;;  %s1943_s21 = smov 39  }
 0x115   : > { %v541_v16 = vpop.permute.xlu0 %540  ;;  %418 = vrot.lane.b32.xlu1 %v2257_v4, %s1931_s28 }
 0x116   : > { %v543_v17 = vsel %vm542_vm1, %v539_v14, %v541_v16  ;;  %vm614_vm1 = vcmask 97280  }
 0x117   : > { %545 = vst [vmem:[#allocation2 + $0x40] sm:$0x3] %v543_v17  ;;  %420 = vrot.lane.b32.xlu0 %v2263_v6, %s1931_s28  ;;  %v549_v18 = vpop.permute.xlu1 %548  ;;  %s1944_s28 = smov 38  }
 0x118   : > { %v551_v19 = vsel %vm550_vm2, %v547_v15, %v549_v18  ;;  %v1649_v15 = vld [vmem:[#allocation10 + $0x24] ss:$8 sps:$4 sm:$0xff]   ;;  %vm656_vm2 = vcmask 990208  }
 0x119   : > { %553 = vst [vmem:[#allocation2 + $0x40] sm:$0xc] %v551_v19  ;;  %v555_v20 = vpop.permute.xlu0 %554  ;;  %426 = vrot.lane.b32.xlu1 %v2269_v9, %s1932_s8  ;;  %813 = vmatprep.mubr.bf16.mxu1 %v1649_v15 }
 0x11b   : > { %428 = vrot.lane.b32.xlu0 %v2273_v10, %s1932_s8  ;;  %v557_v21 = vpop.permute.xlu1 %556  ;;  %s1945_s8 = smov 37  }
 0x11c   : > { %v559_v22 = vsel %vm558_vm3, %v555_v20, %v557_v21  ;;  %vm668_vm3 = vcmask 982016  }
 0x11d   : > { %561 = vst [vmem:[#allocation2 + $0x40] sm:$0x30] %v559_v22  ;;  %v563_v23 = vpop.permute.xlu0 %562  ;;  %434 = vrot.lane.b32.xlu1 %v2277_v11, %s1933_s24 }
 0x11f   : > { %436 = vrot.lane.b32.xlu0 %v2281_v12, %s1933_s24  ;;  %v565_v24 = vpop.permute.xlu1 %564  ;;  %s1372_s24 = sshll.u32 %s2248_s23, 3 }
 0x120   : > { %v567_v25 = vsel %vm566_vm4, %v563_v23, %v565_v24  ;;  %vm680_vm4 = vcmask 973824  }
 0x121   : > { %569 = vst [vmem:[#allocation2 + $0x40] sm:$0xc0] %v567_v25  ;;  %v287_v26 = vpop.permute.xlu0 %286  ;;  %442 = vrot.lane.b32.xlu1 %v2252_v2, %s1934_s29 }
 0x123   : > { %444 = vrot.lane.b32.xlu0 %v2259_v5, %s1934_s29  ;;  %v289_v27 = vpop.permute.xlu1 %288  ;;  %s2384_s29 = scalar_lea.vmem %s2229_s11, %s1372_s24 [#allocation11] }
 0x124   : > { %v291_v28 = vsel %vm290_vm5, %v287_v26, %v289_v27  ;;  %vm350_vm5 = vcmask 859136  }
 0x125   : > { %293 = vst [vmem:[#allocation2] sm:$0xc] %v291_v28  ;;  %v297_v29 = vpop.permute.xlu0 %296  ;;  %450 = vrot.lane.b32.xlu1 %v2257_v4, %s1935_s15 }
 0x127   : > { %452 = vrot.lane.b32.xlu0 %v2263_v6, %s1935_s15  ;;  %v299_v30 = vpop.permute.xlu1 %298 }
 0x128   : > { %v301_v31 = vsel %vm300_vm6, %v297_v29, %v299_v30  ;;  %v717_v32 = vld [vmem:[#allocation2 + $0x40] sm:$0xff]  ;;  %vm358_vm6 = vcmask 850944  }
 0x129   : > { %303 = vst [vmem:[#allocation2] sm:$0x30] %v301_v31  ;;  %v307_v33 = vpop.permute.xlu0 %306  ;;  %1377 = vmatprep.subr.bf16.mxu0 %v717_v32  ;;  %1417 = vmatprep.subr.bf16.mxu1 %v717_v32 }
 0x12a   : > { %458 = vrot.lane.b32.xlu1 %v2269_v9, %s1936_s26 }
 0x12b   : > { %460 = vrot.lane.b32.xlu0 %v2273_v10, %s1936_s26  ;;  %v309_v34 = vpop.permute.xlu1 %308 }
 0x12c   : > { %v311_v35 = vsel %vm310_vm7, %v307_v33, %v309_v34  ;;  %vm366_vm7 = vcmask 842752  }
 0x12d   : > { %313 = vst [vmem:[#allocation2] sm:$0xc0] %v311_v35  ;;  %v571_v36 = vpop.permute.xlu0 %570 }
 0x12e   : > { %466 = vrot.lane.b32.xlu1 %v2277_v11, %s1937_s4 }
 0x12f   : > { %468 = vrot.lane.b32.xlu0 %v2281_v12, %s1937_s4  ;;  %v573_v37 = vpop.permute.xlu1 %572 }
 0x130   : > { %v575_v38 = vsel %vm574_vm8, %v571_v36, %v573_v37  ;;  %vm374_vm8 = vcmask 834560  }
 0x131   : > { %577 = vst [vmem:[#allocation2 + $0x48] sm:$0x3] %v575_v38  ;;  %v579_v39 = vpop.permute.xlu0 %578 }
 0x132   : > { %474 = vrot.lane.b32.xlu1 %v2252_v2, %s1938_s30 }
 0x133   : > { %476 = vrot.lane.b32.xlu0 %v2259_v5, %s1938_s30  ;;  %v581_v40 = vpop.permute.xlu1 %580 }
 0x134   : > { %v583_v41 = vsel %vm582_vm9, %v579_v39, %v581_v40  ;;  %v709_v42 = vld [vmem:[#allocation2] sm:$0xff]  ;;  %vm382_vm9 = vcmask 826368  }
 0x135   : > { %585 = vst [vmem:[#allocation2 + $0x48] sm:$0xc] %v583_v41  ;;  %v587_v43 = vpop.permute.xlu0 %586  ;;  %1378 = vmatpush3.bf16.msra.mxu0 %v709_v42  ;;  %1425 = vmatpush3.bf16.msra.mxu1 %v709_v42 }
 0x136   : > { %482 = vrot.lane.b32.xlu1 %v2257_v4, %s1939_s25 }
 0x137   : > { %484 = vrot.lane.b32.xlu0 %v2263_v6, %s1939_s25  ;;  %v589_v44 = vpop.permute.xlu1 %588 }
 0x138   : > { %v591_v45 = vsel %vm590_vm10, %v587_v43, %v589_v44  ;;  %vm390_vm10 = vcmask 818176  }
 0x139   : > { %593 = vst [vmem:[#allocation2 + $0x48] sm:$0x30] %v591_v45  ;;  %v595_v46 = vpop.permute.xlu0 %594 }
 0x13a   : > { %490 = vrot.lane.b32.xlu1 %v2269_v9, %s1940_s7 }
 0x13b   : > { %492 = vrot.lane.b32.xlu0 %v2273_v10, %s1940_s7  ;;  %v597_v47 = vpop.permute.xlu1 %596 }
 0x13c   : > { %v599_v48 = vsel %vm598_vm11, %v595_v46, %v597_v47  ;;  %vm398_vm11 = vcmask 687104  }
 0x13d   : > { %601 = vst [vmem:[#allocation2 + $0x48] sm:$0xc0] %v599_v48  ;;  %v1610_v49 = vpop.permute.xlu0 %1609 }
 0x13e   : > { %v1612_v50 = vunpack.i.h.bf16 %v1610_v49  ;;  %v1611_v51 = vunpack.i.l.bf16 %v1610_v49  ;;  %498 = vrot.lane.b32.xlu1 %v2277_v11, %s1941_s20 }
 0x13f   : > { %500 = vrot.lane.b32.xlu0 %v2281_v12, %s1941_s20  ;;  %v1615_v52 = vpop.permute.xlu1 %1614 }
 0x140   : > { %v1617_v53 = vunpack.i.h.bf16 %v1615_v52  ;;  %v1616_v54 = vunpack.i.l.bf16 %v1615_v52  ;;  %v624_v55 = vsel %vm318_vm12, %v1611_v51, %v1612_v50 }
 0x141   : > { %v315_v56 = vpop.permute.xlu0 %314  ;;  %v626_v57 = vpack.c.bf16 %v624_v55, %v624_v55 }
 0x142   : > { %506 = vrot.lane.b32.xlu1 %v2252_v2, %s1942_s6  ;;  %v636_v58 = vsel %vm326_vm13, %v1616_v54, %v1617_v53 }
 0x143   : > { %508 = vrot.lane.b32.xlu0 %v2259_v5, %s1942_s6  ;;  %v628_v59 = vrot.slane %v626_v57, 4  ;;  %v317_v60 = vpop.permute.xlu1 %316  ;;  %v638_v61 = vpack.c.bf16 %v636_v58, %v636_v58 }
 0x144   : > { %v319_v62 = vsel %vm318_vm12, %v315_v56, %v317_v60  ;;  %v718_v63 = vld [vmem:[#allocation2 + $0x48] sm:$0xff]  ;;  %vm406_vm12 = vcmask 678912  }
 0x145   : > { %630 = vst [vmem:[#allocation2 + $0x50] sm:$0x30] %v628_v59  ;;  %321 = vst [vmem:[#allocation2 + $0x8] sm:$0x3] %v319_v62  ;;  %v323_v0 = vpop.permute.xlu0 %322  ;;  %1379 = vmatprep.subr.bf16.mxu0 %v718_v63  ;;  %1418 = vmatprep.subr.bf16.mxu1 %v718_v63  ;;  %v640_v1 = vrot.slane %v638_v61, 2 }
 0x146   : > { %514 = vrot.lane.b32.xlu1 %v2257_v4, %s1943_s21 }
 0x147   : > { %516 = vrot.lane.b32.xlu0 %v2263_v6, %s1943_s21  ;;  %v325_v2 = vpop.permute.xlu1 %324  ;;  %642 = vst [vmem:[#allocation2 + $0x50] sm:$0xc0] %v640_v1 }
 0x148   : > { %v327_v3 = vsel %vm326_vm13, %v323_v0, %v325_v2  ;;  %vm692_vm13 = vcmask 965632  }
 0x149   : > { %329 = vst [vmem:[#allocation2 + $0x8] sm:$0xc] %v327_v3  ;;  %v331_v5 = vpop.permute.xlu0 %330 }
 0x14a   : > { %522 = vrot.lane.b32.xlu1 %v2269_v9, %s1944_s28 }
 0x14b   : > { %524 = vrot.lane.b32.xlu0 %v2273_v10, %s1944_s28  ;;  %v333_v7 = vpop.permute.xlu1 %332 }
 0x14c   : > { %v335_v14 = vsel %vm334_vm14, %v331_v5, %v333_v7 }
 0x14d   : > { %337 = vst [vmem:[#allocation2 + $0x8] sm:$0x30] %v335_v14  ;;  %v339_v4 = vpop.permute.xlu0 %338 }
 0x14e   : > { %530 = vrot.lane.b32.xlu1 %v2277_v11, %s1945_s8 }
 0x14f   : > { %532 = vrot.lane.b32.xlu0 %v2281_v12, %s1945_s8  ;;  %v341_v6 = vpop.permute.xlu1 %340 }
 0x150   : > { %v343_v16 = vsel %vm342_vm15, %v339_v4, %v341_v6  ;;  %vm422_vm15 = vcmask 662528  }
 0x151   : > { %345 = vst [vmem:[#allocation2 + $0x8] sm:$0xc0] %v343_v16  ;;  %v603_v9 = vpop.permute.xlu0 %602 }
 0x153   : > { %v605_v10 = vpop.permute.xlu1 %604 }
 0x154   : > { %v607_v17 = vsel %vm606_vm0, %v603_v9, %v605_v10  ;;  %vm430_vm0 = vcmask 654336  }
 0x155   : > { %609 = vst [vmem:[#allocation2 + $0x50] sm:$0x3] %v607_v17  ;;  %v611_v18 = vpop.permute.xlu0 %610 }
 0x157   : > { %v613_v19 = vpop.permute.xlu1 %612 }
 0x158   : > { %v615_v20 = vsel %vm614_vm1, %v611_v18, %v613_v19  ;;  %v710_v21 = vld [vmem:[#allocation2 + $0x8] sm:$0xff]  ;;  %vm438_vm1 = vcmask 646144  }
 0x159   : > { %617 = vst [vmem:[#allocation2 + $0x50] sm:$0xc] %v615_v20  ;;  %v1620_v22 = vpop.permute.xlu0 %1619  ;;  %1380 = vmatpush3.bf16.msra.mxu0 %v710_v21  ;;  %1426 = vmatpush3.bf16.msra.mxu1 %v710_v21 }
 0x15a   : > { %v1622_v11 = vunpack.i.h.bf16 %v1620_v22  ;;  %v1621_v12 = vunpack.i.l.bf16 %v1620_v22 }
 0x15b   : > { %v1625_v23 = vpop.permute.xlu1 %1624 }
 0x15c   : > { %v657_v24 = vsel %vm656_vm2, %v1621_v12, %v1622_v11  ;;  %v1627_v25 = vunpack.i.h.bf16 %v1625_v23  ;;  %v1626_v26 = vunpack.i.l.bf16 %v1625_v23  ;;  %vm446_vm2 = vcmask 637952  }
 0x15d   : > { %v659_v27 = vpack.c.bf16 %v657_v24, %v657_v24  ;;  %v1630_v28 = vpop.permute.xlu0 %1629 }
 0x15e   : > { %v669_v29 = vsel %vm668_vm3, %v1626_v26, %v1627_v25  ;;  %v1632_v30 = vunpack.i.h.bf16 %v1630_v28  ;;  %v1631_v31 = vunpack.i.l.bf16 %v1630_v28  ;;  %vm454_vm3 = vcmask 506880  }
 0x15f   : > { %v661_v32 = vrot.slane %v659_v27, 6  ;;  %v671_v33 = vpack.c.bf16 %v669_v29, %v669_v29  ;;  %v347_v34 = vpop.permute.xlu1 %346 }
 0x160   : > { %v681_v35 = vsel %vm680_vm4, %v1631_v31, %v1632_v30  ;;  %v719_v36 = vld [vmem:[#allocation2 + $0x50] sm:$0xff]  ;;  %vm462_vm4 = vcmask 498688  }
 0x161   : > { %663 = vst [vmem:[#allocation2 + $0x58] sm:$0xc] %v661_v32  ;;  %v673_v37 = vrot.slane %v671_v33, 4  ;;  %v683_v38 = vpack.c.bf16 %v681_v35, %v681_v35  ;;  %v349_v39 = vpop.permute.xlu0 %348  ;;  %1381 = vmatprep.subr.bf16.mxu0 %v719_v36  ;;  %1419 = vmatprep.subr.bf16.mxu1 %v719_v36 }
 0x162   : > { %v351_v40 = vsel %vm350_vm5, %v347_v34, %v349_v39  ;;  %vm470_vm5 = vcmask 490496  }
 0x163   : > { %675 = vst [vmem:[#allocation2 + $0x58] sm:$0x30] %v673_v37  ;;  %v685_v41 = vrot.slane %v683_v38, 2  ;;  %353 = vst [vmem:[#allocation2 + $0x10] sm:$0x3] %v351_v40  ;;  %v355_v42 = vpop.permute.xlu1 %354 }
 0x165   : > { %687 = vst [vmem:[#allocation2 + $0x58] sm:$0xc0] %v685_v41  ;;  %v357_v43 = vpop.permute.xlu0 %356 }
 0x166   : > { %v359_v44 = vsel %vm358_vm6, %v355_v42, %v357_v43  ;;  %vm478_vm6 = vcmask 482304  }
 0x167   : > { %361 = vst [vmem:[#allocation2 + $0x10] sm:$0xc] %v359_v44  ;;  %v363_v45 = vpop.permute.xlu1 %362 }
 0x169   : > { %v365_v46 = vpop.permute.xlu0 %364 }
 0x16a   : > { %v367_v47 = vsel %vm366_vm7, %v363_v45, %v365_v46  ;;  %vm486_vm7 = vcmask 474112  }
 0x16b   : > { %369 = vst [vmem:[#allocation2 + $0x10] sm:$0x30] %v367_v47  ;;  %v371_v48 = vpop.permute.xlu1 %370 }
 0x16d   : > { %v373_v49 = vpop.permute.xlu0 %372 }
 0x16e   : > { %v375_v50 = vsel %vm374_vm8, %v371_v48, %v373_v49  ;;  %vm494_vm8 = vcmask 465920  }
 0x16f   : > { %377 = vst [vmem:[#allocation2 + $0x10] sm:$0xc0] %v375_v50  ;;  %v1635_v51 = vpop.permute.xlu1 %1634 }
 0x170   : > { %v1637_v52 = vunpack.i.h.bf16 %v1635_v51  ;;  %v1636_v53 = vunpack.i.l.bf16 %v1635_v51 }
 0x171   : > { %v379_v54 = vpop.permute.xlu0 %378 }
 0x172   : > { %v648_v55 = vsel %vm334_vm14, %v1636_v53, %v1637_v52  ;;  %vm414_vm14 = vcmask 670720  }
 0x173   : > { %v650_v56 = vpack.c.bf16 %v648_v55, %v648_v55  ;;  %v381_v57 = vpop.permute.xlu1 %380 }
 0x174   : > { %v383_v58 = vsel %vm382_vm9, %v379_v54, %v381_v57  ;;  %vm502_vm9 = vcmask 457728  }
 0x175   : > { %651 = vst [vmem:[#allocation2 + $0x58] sm:$0x3] %v650_v56  ;;  %385 = vst [vmem:[#allocation2 + $0x18] sm:$0x3] %v383_v58  ;;  %v387_v59 = vpop.permute.xlu0 %386 }
 0x176   : > { %v711_v60 = vld [vmem:[#allocation2 + $0x10] sm:$0xff] }
 0x177   : > { %v389_v61 = vpop.permute.xlu1 %388  ;;  %1382 = vmatpush3.bf16.msra.mxu0 %v711_v60  ;;  %1427 = vmatpush3.bf16.msra.mxu1 %v711_v60 }
 0x178   : > { %v391_v62 = vsel %vm390_vm10, %v387_v59, %v389_v61  ;;  %vm510_vm10 = vcmask 326656  }
 0x179   : > { %393 = vst [vmem:[#allocation2 + $0x18] sm:$0xc] %v391_v62  ;;  %v395_v63 = vpop.permute.xlu0 %394 }
 0x17b   : > { %v397_v0 = vpop.permute.xlu1 %396 }
 0x17c   : > { %v399_v1 = vsel %vm398_vm11, %v395_v63, %v397_v0  ;;  %v720_v2 = vld [vmem:[#allocation2 + $0x58] sm:$0xff]  ;;  %vm518_vm11 = vcmask 318464  }
 0x17d   : > { %401 = vst [vmem:[#allocation2 + $0x18] sm:$0x30] %v399_v1  ;;  %v403_v3 = vpop.permute.xlu0 %402  ;;  %1383 = vmatprep.subr.bf16.mxu0 %v720_v2  ;;  %1420 = vmatprep.subr.bf16.mxu1 %v720_v2  ;;  %v1644_v2 = vld [vmem:[#allocation10] ss:$8 sps:$4 sm:$0xff]  }
 0x17f   : > { %v405_v5 = vpop.permute.xlu1 %404 }
 0x180   : > { %v407_v7 = vsel %vm406_vm12, %v403_v3, %v405_v5  ;;  %vm526_vm12 = vcmask 310272   ;;  %v1647_v3 = vld [vmem:[#allocation10 + $0x20] ss:$8 sps:$4 sm:$0xff]   ;;  %v1650_v5 = vld [vmem:[#allocation10 + $0x14] ss:$8 sps:$4 sm:$0xff]  }
 0x181   : > { %409 = vst [vmem:[#allocation2 + $0x18] sm:$0xc0] %v407_v7  ;;  %v1640_v8 = vpop.permute.xlu0 %1639  ;;  %v1653_v7 = vld [vmem:[#allocation10 + $0x34] ss:$8 sps:$4 sm:$0xff]  }
 0x182   : > { %v1642_v14 = vunpack.i.h.bf16 %v1640_v8  ;;  %v1641_v15 = vunpack.i.l.bf16 %v1640_v8  ;;  %v1655_v8 = vld [vmem:[#allocation10 + $0x30] ss:$8 sps:$4 sm:$0xff]  }
 0x183   : > { %v411_v4 = vpop.permute.xlu1 %410 }
 0x184   : > { %v693_v6 = vsel %vm692_vm13, %v1641_v15, %v1642_v14  ;;  %vm534_vm13 = vcmask 302080  }
 0x185   : > { %v695_v16 = vpack.c.bf16 %v693_v6, %v693_v6  ;;  %v413_v9 = vpop.permute.xlu0 %412 }
 0x186   : > { %v415_v10 = vsel %vm414_vm14, %v411_v4, %v413_v9  ;;  %vm877_vm14 = vcmask 7168  }
 0x187   : > { %696 = vst [vmem:[#allocation2 + $0x60] sm:$0x3] %v695_v16  ;;  %417 = vst [vmem:[#allocation2 + $0x20] sm:$0x3] %v415_v10  ;;  %v419_v17 = vpop.permute.xlu1 %418  ;;  %v1371_v16 = vld [vmem:[%s2206_s0] ss:$0 sm:$0xff] }
 0x188   : > { %v712_v18 = vld [vmem:[#allocation2 + $0x18] sm:$0xff] }
 0x189   : > { %v421_v19 = vpop.permute.xlu0 %420  ;;  %1384 = vmatpush3.bf16.msra.mxu0 %v712_v18  ;;  %1428 = vmatpush3.bf16.msra.mxu1 %v712_v18 }
 0x18a   : > { %v423_v20 = vsel %vm422_vm15, %v419_v17, %v421_v19 }
 0x18b   : > { %425 = vst [vmem:[#allocation2 + $0x20] sm:$0xc] %v423_v20  ;;  %v427_v21 = vpop.permute.xlu1 %426 }
 0x18d   : > { %v429_v22 = vpop.permute.xlu0 %428 }
 0x18e   : > { %v431_v11 = vsel %vm430_vm0, %v427_v21, %v429_v22  ;;  %v721_v12 = vld [vmem:[#allocation2 + $0x60] sm:$0xff] }
 0x18f   : > { %433 = vst [vmem:[#allocation2 + $0x20] sm:$0x30] %v431_v11  ;;  %1385 = vmatprep.subr.bf16.mxu0 %v721_v12  ;;  %1421 = vmatprep.subr.bf16.mxu1 %v721_v12  ;;  %v435_v23 = vpop.permute.xlu1 %434 }
 0x191   : > { %v437_v24 = vpop.permute.xlu0 %436 }
 0x192   : > { %v439_v25 = vsel %vm438_vm1, %v435_v23, %v437_v24 }
 0x193   : > { %441 = vst [vmem:[#allocation2 + $0x20] sm:$0xc0] %v439_v25  ;;  %v443_v26 = vpop.permute.xlu1 %442 }
 0x195   : > { %v445_v27 = vpop.permute.xlu0 %444 }
 0x196   : > { %v447_v28 = vsel %vm446_vm2, %v443_v26, %v445_v27 }
 0x197   : > { %449 = vst [vmem:[#allocation2 + $0x28] sm:$0x3] %v447_v28  ;;  %v451_v29 = vpop.permute.xlu1 %450 }
 0x199   : > { %v453_v30 = vpop.permute.xlu0 %452 }
 0x19a   : > { %v455_v31 = vsel %vm454_vm3, %v451_v29, %v453_v30  ;;  %v713_v32 = vld [vmem:[#allocation2 + $0x20] sm:$0xff] }
 0x19b   : > { %457 = vst [vmem:[#allocation2 + $0x28] sm:$0xc] %v455_v31  ;;  %1386 = vmatpush3.bf16.msra.mxu0 %v713_v32  ;;  %1429 = vmatpush3.bf16.msra.mxu1 %v713_v32 }
 0x19c   : > { %v459_v33 = vpop.permute.xlu1 %458  ;;  %1387 = vmatprep.subr.bf16.mxu0 %v1927_v13  ;;  %1422 = vmatprep.subr.bf16.mxu1 %v1927_v13 }
 0x19d   : > { %v461_v34 = vpop.permute.xlu0 %460 }
 0x19e   : > { %v463_v35 = vsel %vm462_vm4, %v459_v33, %v461_v34 }
 0x19f   : > { %465 = vst [vmem:[#allocation2 + $0x28] sm:$0x30] %v463_v35 }
 0x1a0   : > { %v467_v36 = vpop.permute.xlu1 %466 }
 0x1a1   : > { %v469_v37 = vpop.permute.xlu0 %468 }
 0x1a2   : > { %v471_v38 = vsel %vm470_vm5, %v467_v36, %v469_v37 }
 0x1a3   : > { %473 = vst [vmem:[#allocation2 + $0x28] sm:$0xc0] %v471_v38 }
 0x1a4   : > { %v475_v39 = vpop.permute.xlu1 %474 }
 0x1a5   : > { %v477_v40 = vpop.permute.xlu0 %476 }
 0x1a6   : > { %v479_v41 = vsel %vm478_vm6, %v475_v39, %v477_v40 }
 0x1a7   : > { %481 = vst [vmem:[#allocation2 + $0x30] sm:$0x3] %v479_v41 }
 0x1a8   : > { %v483_v42 = vpop.permute.xlu1 %482 }
 0x1a9   : > { %v485_v43 = vpop.permute.xlu0 %484 }
 0x1aa   : > { %v487_v44 = vsel %vm486_vm7, %v483_v42, %v485_v43  ;;  %v714_v45 = vld [vmem:[#allocation2 + $0x28] sm:$0xff] }
 0x1ab   : > { %489 = vst [vmem:[#allocation2 + $0x30] sm:$0xc] %v487_v44  ;;  %1388 = vmatpush3.bf16.msra.mxu0 %v714_v45  ;;  %1430 = vmatpush3.bf16.msra.mxu1 %v714_v45 }
 0x1ac   : > { %v491_v46 = vpop.permute.xlu1 %490  ;;  %1389 = vmatprep.subr.bf16.mxu0 %v1927_v13  ;;  %1423 = vmatprep.subr.bf16.mxu1 %v1927_v13 }
 0x1ad   : > { %v493_v47 = vpop.permute.xlu0 %492 }
 0x1ae   : > { %v495_v48 = vsel %vm494_vm8, %v491_v46, %v493_v47 }
 0x1af   : > { %497 = vst [vmem:[#allocation2 + $0x30] sm:$0x30] %v495_v48 }
 0x1b0   : > { %v499_v49 = vpop.permute.xlu1 %498 }
 0x1b1   : > { %v501_v50 = vpop.permute.xlu0 %500 }
 0x1b2   : > { %v503_v51 = vsel %vm502_vm9, %v499_v49, %v501_v50  ;;  %v849_v49 = vld [vmem:[#allocation3 + $0x20] sm:$0xff] }
 0x1b3   : > { %505 = vst [vmem:[#allocation2 + $0x30] sm:$0xc0] %v503_v51  ;;  %v845_v50 = vld [vmem:[#allocation3] sm:$0xff] }
 0x1b4   : > { %v507_v52 = vpop.permute.xlu1 %506 }
 0x1b5   : > { %v509_v53 = vpop.permute.xlu0 %508 }
 0x1b6   : > { %v511_v54 = vsel %vm510_vm10, %v507_v52, %v509_v53 }
 0x1b7   : > { %513 = vst [vmem:[#allocation2 + $0x38] sm:$0x3] %v511_v54 }
 0x1b8   : > { %v515_v55 = vpop.permute.xlu1 %514 }
 0x1b9   : > { %v517_v56 = vpop.permute.xlu0 %516 }
 0x1ba   : > { %v519_v57 = vsel %vm518_vm11, %v515_v55, %v517_v56  ;;  %v715_v58 = vld [vmem:[#allocation2 + $0x30] sm:$0xff]  ;;  %v846_v55 = vld [vmem:[#allocation3 + $0x8] sm:$0xff] }
 0x1bb   : > { %521 = vst [vmem:[#allocation2 + $0x38] sm:$0xc] %v519_v57  ;;  %1390 = vmatpush3.bf16.msra.mxu0 %v715_v58  ;;  %1431 = vmatpush3.bf16.msra.mxu1 %v715_v58  ;;  %v850_v56 = vld [vmem:[#allocation3 + $0x28] sm:$0xff] }
 0x1bc   : > { %v523_v59 = vpop.permute.xlu1 %522  ;;  %1391 = vmatprep.subr.bf16.mxu0 %v1927_v13  ;;  %1424 = vmatprep.subr.bf16.mxu1 %v1927_v13  ;;  %v1652_v13 = vld [vmem:[#allocation10 + $0x10] ss:$8 sps:$4 sm:$0xff]  }
 0x1bd   : > { %v525_v60 = vpop.permute.xlu0 %524 }
 0x1be   : > { %v527_v61 = vsel %vm526_vm12, %v523_v59, %v525_v60 }
 0x1bf   : > { %529 = vst [vmem:[#allocation2 + $0x38] sm:$0x30] %v527_v61  ;;  %v887_v61 = vld [vmem:[#allocation4 + $0x8] sm:$0xff] }
 0x1c0   : > { %v531_v62 = vpop.permute.xlu1 %530 }
 0x1c1   : > { %v533_v63 = vpop.permute.xlu0 %532 }
 0x1c2   : > { %v535_v0 = vsel %vm534_vm13, %v531_v62, %v533_v63  ;;  %v886_v62 = vld [vmem:[#allocation4] sm:$0xff] }
 0x1c3   : > { %537 = vst [vmem:[#allocation2 + $0x38] sm:$0xc0] %v535_v0 }
 0x1ca   : > { %v716_v1 = vld [vmem:[#allocation2 + $0x38] sm:$0xff] }
 0x1cb   : > { %1392 = vmatpush3.bf16.msra.mxu0 %v716_v1  ;;  %1432 = vmatpush3.bf16.msra.mxu1 %v716_v1 }
 0x1ce   : > { %798 = vmatmul.mubr.bf16.vlgmr.msra.gmra.mrb[0].mxu0 %v1644_v2  ;;  %814 = vmatmul.mubr.bf16.vlgmr.msra.gmra.mrb[0].mxu1 %v1647_v3  ;;  %v891_v3 = vld [vmem:[#allocation4 + $0x28] sm:$0xff] }
 0x1cf   : > { %805 = vmatprep.mubr.bf16.mxu0 %v1650_v5  ;;  %821 = vmatprep.mubr.bf16.mxu1 %v1653_v7  ;;  %v890_v5 = vld [vmem:[#allocation4 + $0x20] sm:$0xff] }
 0x1d6   : > { %806 = vmatmul.mubr.bf16.gmra.mrb[4].mxu0 %v1652_v13  ;;  %822 = vmatmul.mubr.bf16.gmra.mrb[4].mxu1 %v1655_v8 }
 0x2a1   : > { %v1393_v14 = vpop.f32.mrb[0].mxu0  ;;  %v1405_v15 = vpop.f32.mrb[0].mxu1 }
 0x2a2   : > { %v1394_v4 = vpop.f32.mrb[1].mxu0  ;;  %v1406_v6 = vpop.f32.mrb[1].mxu1 }
 0x2a3   : > { %v1395_v9 = vadd.f32 %v1394_v4, %v1393_v14  ;;  %v1407_v10 = vadd.f32 %v1406_v6, %v1405_v15  ;;  %v1396_v17 = vpop.f32.mrb[2].mxu0  ;;  %v1408_v18 = vpop.f32.mrb[2].mxu1  ;;  %v848_v15 = vld [vmem:[#allocation3 + $0x18] sm:$0xff]  ;;  %v847_v4 = vld [vmem:[#allocation3 + $0x10] sm:$0xff] }
 0x2a4   : > { %v1397_v19 = vpop.f32.mrb[3].mxu0  ;;  %v1409_v20 = vpop.f32.mrb[3].mxu1 }
 0x2a5   : > { %936 = vst [vmem:[%s2384_s29] sm:$0xff] %v1395_v9  ;;  %940 = vst [vmem:[%s2384_s29 + $0x60] sm:$0xff] %v1407_v10  ;;  %v1398_v21 = vadd.f32 %v1397_v19, %v1396_v17  ;;  %v1410_v22 = vadd.f32 %v1409_v20, %v1408_v18  ;;  %v841_v11 = vmul.f32 %v1407_v10, %v1371_v16  ;;  %v852_v17 = vld [vmem:[#allocation3 + $0x38] sm:$0xff]  ;;  %v851_v18 = vld [vmem:[#allocation3 + $0x30] sm:$0xff] }
 0x2a6   : > { %v837_v12 = vmul.f32 %v1395_v9, %v1371_v16 }
 0x2a7   : > { %937 = vst [vmem:[%s2384_s29 + $0x18] sm:$0xff] %v1398_v21  ;;  %941 = vst [vmem:[%s2384_s29 + $0x78] sm:$0xff] %v1410_v22  ;;  %861 = vadd.xlane.f32.xlu0 %v841_v11  ;;  %v838_v24 = vmul.f32 %v1398_v21, %v1371_v16  ;;  %v842_v25 = vmul.f32 %v1410_v22, %v1371_v16  ;;  %v898_v40 = vmul.f32 %v1407_v10, %v841_v11  ;;  %v889_v11 = vld [vmem:[#allocation4 + $0x18] sm:$0xff] }
 0x2a8   : > { %853 = vadd.xlane.f32.xlu1 %v837_v12  ;;  %v894_v37 = vmul.f32 %v1395_v9, %v837_v12  ;;  %v888_v12 = vld [vmem:[#allocation4 + $0x10] sm:$0xff] }
 0x2a9   : > { %v1399_v23 = vpop.f32.mrb[4].mxu0  ;;  %v1411_v26 = vpop.f32.mrb[4].mxu1  ;;  %v895_v36 = vmul.f32 %v1398_v21, %v838_v24  ;;  %v899_v39 = vmul.f32 %v1410_v22, %v842_v25 }
 0x2aa   : > { %v1400_v27 = vpop.f32.mrb[5].mxu0  ;;  %v1412_v28 = vpop.f32.mrb[5].mxu1 }
 0x2ab   : > { %v1401_v29 = vadd.f32 %v1400_v27, %v1399_v23  ;;  %855 = vadd.xlane.f32.xlu0 %v838_v24  ;;  %v1402_v30 = vpop.f32.mrb[6].mxu0  ;;  %v1413_v31 = vadd.f32 %v1412_v28, %v1411_v26  ;;  %v1414_v32 = vpop.f32.mrb[6].mxu1  ;;  %v893_v27 = vld [vmem:[#allocation4 + $0x38] sm:$0xff]  ;;  %v892_v28 = vld [vmem:[#allocation4 + $0x30] sm:$0xff] }
 0x2ac   : > { %863 = vadd.xlane.f32.xlu1 %v842_v25  ;;  %v1403_v33 = vpop.f32.mrb[7].mxu0  ;;  %v1415_v34 = vpop.f32.mrb[7].mxu1 }
 0x2ad   : > { %938 = vst [vmem:[%s2384_s29 + $0x30] sm:$0xff] %v1401_v29  ;;  %v1404_v35 = vadd.f32 %v1403_v33, %v1402_v30  ;;  %942 = vst [vmem:[%s2384_s29 + $0x90] sm:$0xff] %v1413_v31  ;;  %v1416_v38 = vadd.f32 %v1415_v34, %v1414_v32  ;;  %v839_v42 = vmul.f32 %v1401_v29, %v1371_v16 }
 0x2ae   : > { %v843_v44 = vmul.f32 %v1413_v31, %v1371_v16 }
 0x2af   : > { %939 = vst [vmem:[%s2384_s29 + $0x48] sm:$0xff] %v1404_v35  ;;  %902 = vadd.xlane.f32.xlu0 %v894_v37  ;;  %943 = vst [vmem:[%s2384_s29 + $0xa8] sm:$0xff] %v1416_v38  ;;  %v840_v41 = vmul.f32 %v1404_v35, %v1371_v16  ;;  %v844_v43 = vmul.f32 %v1416_v38, %v1371_v16  ;;  %v896_v46 = vmul.f32 %v1401_v29, %v839_v42 }
 0x2b0   : > { %904 = vadd.xlane.f32.xlu1 %v895_v36  ;;  %v900_v48 = vmul.f32 %v1413_v31, %v843_v44  ;;  %v1946_v36 = vmov (!%p1373_p9), 0  }
 0x2b1   : > { %v897_v45 = vmul.f32 %v1404_v35, %v840_v41  ;;  %v901_v47 = vmul.f32 %v1416_v38, %v844_v43  ;;  %1657 = vset.pattern.permute.xlu1 (!%p1373_p9), %v1946_v36  ;;  %1656 = vset.pattern.permute.xlu0 (!%p1373_p9), %v1946_v36 }
 0x2b3   : > { %910 = vadd.xlane.f32.xlu0 %v898_v40 }
 0x2b4   : > { %912 = vadd.xlane.f32.xlu1 %v899_v39 }
 0x2b7   : > { %857 = vadd.xlane.f32.xlu0 %v839_v42 }
 0x2b8   : > { %859 = vadd.xlane.f32.xlu1 %v840_v41 }
 0x2bb   : > { %865 = vadd.xlane.f32.xlu0 %v843_v44 }
 0x2bc   : > { %867 = vadd.xlane.f32.xlu1 %v844_v43 }
 0x2bf   : > { %906 = vadd.xlane.f32.xlu0 %v896_v46 }
 0x2c0   : > { %908 = vadd.xlane.f32.xlu1 %v897_v45 }
 0x2c3   : > { %914 = vadd.xlane.f32.xlu0 %v900_v48 }
 0x2c4   : > { %916 = vadd.xlane.f32.xlu1 %v901_v47 }
 0x334   : > { %v862_v51 = vpop.xlane.xlu0 %861 }
 0x335   : > { %v854_v52 = vpop.xlane.xlu1 %853  ;;  %v873_v53 = vadd.f32 %v862_v51, %v849_v49 }
 0x336   : > { %v869_v54 = vadd.f32 %v854_v52, %v845_v50 }
 0x337   : > { %882 = vst.msk [vmem:[#allocation3 + $0x20] sm:$0xff] %vm877_vm14, %v873_v53 }
 0x338   : > { %878 = vst.msk [vmem:[#allocation3] sm:$0xff] %vm877_vm14, %v869_v54  ;;  %v856_v57 = vpop.xlane.xlu0 %855 }
 0x339   : > { %v864_v58 = vpop.xlane.xlu1 %863  ;;  %v870_v59 = vadd.f32 %v856_v57, %v846_v55 }
 0x33a   : > { %v874_v60 = vadd.f32 %v864_v58, %v850_v56 }
 0x33b   : > { %879 = vst.msk [vmem:[#allocation3 + $0x8] sm:$0xff] %vm877_vm14, %v870_v59 }
 0x33c   : > { %883 = vst.msk [vmem:[#allocation3 + $0x28] sm:$0xff] %vm877_vm14, %v874_v60  ;;  %v903_v0 = vpop.xlane.xlu0 %902 }
 0x33d   : > { %v905_v63 = vpop.xlane.xlu1 %904  ;;  %v918_v2 = vadd.f32 %v903_v0, %v886_v62 }
 0x33e   : > { %v919_v1 = vadd.f32 %v905_v63, %v887_v61  ;;  %v952_v54 = vld [vmem:[#allocation3 + $0x20] sm:$0xff] (!%p1373_p9) }
 0x33f   : > { %926 = vst.msk [vmem:[#allocation4] sm:$0xff] %vm877_vm14, %v918_v2  ;;  %v948_v35 = vld [vmem:[#allocation3] sm:$0xff] (!%p1373_p9)  ;;  %v2426_v59 = vmul.f32 (!%p1373_p9), 0.00390625, %v952_v54 }
 0x340   : > { %927 = vst.msk [vmem:[#allocation4 + $0x8] sm:$0xff] %vm877_vm14, %v919_v1  ;;  %v911_v13 = vpop.xlane.xlu0 %910  ;;  %v2414_v39 = vmul.f32 (!%p1373_p9), 0.00390625, %v948_v35  ;;  %v1015_v54 = vld [vmem:[%s2229_s11 + $0x18] sm:$0xff] (!%p1373_p9) }
 0x341   : > { %v913_v7 = vpop.xlane.xlu1 %912  ;;  %v922_v14 = vadd.f32 %v911_v13, %v890_v5  ;;  %v984_v5 = vmul.f32 (!%p1373_p9), %v2426_v59, %v2426_v59 }
 0x342   : > { %v923_v8 = vadd.f32 %v913_v7, %v891_v3  ;;  %v949_v46 = vld [vmem:[#allocation3 + $0x8] sm:$0xff] (!%p1373_p9)  ;;  %v980_v50 = vmul.f32 (!%p1373_p9), %v2414_v39, %v2414_v39 }
 0x343   : > { %930 = vst.msk [vmem:[#allocation4 + $0x20] sm:$0xff] %vm877_vm14, %v922_v14  ;;  %v953_v48 = vld [vmem:[#allocation3 + $0x28] sm:$0xff] (!%p1373_p9)  ;;  %v957_v51 = vmul.f32 (!%p1373_p9), 0.00390625, %v949_v46 }
 0x344   : > { %931 = vst.msk [vmem:[#allocation4 + $0x28] sm:$0xff] %vm877_vm14, %v923_v8  ;;  %v858_v16 = vpop.xlane.xlu0 %857  ;;  %v2424_v57 = vmul.f32 (!%p1373_p9), 0.00390625, %v953_v48  ;;  %v1018_v48 = vld [vmem:[%s2229_s11 + $0x30] sm:$0xff] (!%p1373_p9) }
 0x345   : > { %v860_v6 = vpop.xlane.xlu1 %859  ;;  %v871_v10 = vadd.f32 %v858_v16, %v847_v4  ;;  %v981_v0 = vmul.f32 (!%p1373_p9), %v957_v51, %v957_v51 }
 0x346   : > { %v872_v9 = vadd.f32 %v860_v6, %v848_v15  ;;  %v964_v40 = vld [vmem:[#allocation4] sm:$0xff] (!%p1373_p9)  ;;  %v985_v3 = vmul.f32 (!%p1373_p9), %v2424_v57, %v2424_v57 }
 0x347   : > { %880 = vst.msk [vmem:[#allocation3 + $0x10] sm:$0xff] %vm877_vm14, %v871_v10  ;;  %v972_v43 = vmul.f32 (!%p1373_p9), 0.00390625, %v964_v40  ;;  %v965_v47 = vld [vmem:[#allocation4 + $0x8] sm:$0xff] (!%p1373_p9) }
 0x348   : > { %881 = vst.msk [vmem:[#allocation3 + $0x18] sm:$0xff] %vm877_vm14, %v872_v9  ;;  %v866_v20 = vpop.xlane.xlu0 %865  ;;  %v973_v52 = vmul.f32 (!%p1373_p9), 0.00390625, %v965_v47 }
 0x349   : > { %v868_v19 = vpop.xlane.xlu1 %867  ;;  %v875_v22 = vadd.f32 %v866_v20, %v851_v18  ;;  %v988_v63 = vsub.f32 (!%p1373_p9), %v972_v43, %v980_v50  ;;  %v1020_v50 = vld [vmem:[%s2229_s11 + $0x40] sm:$0xff] (!%p1373_p9) }
 0x34a   : > { %v876_v21 = vadd.f32 %v868_v19, %v852_v17  ;;  %v968_v55 = vld [vmem:[#allocation4 + $0x20] sm:$0xff] (!%p1373_p9)  ;;  %v989_v4 = vsub.f32 (!%p1373_p9), %v973_v52, %v981_v0  ;;  %v1013_v52 = vld [vmem:[%s2229_s11 + $0x8] sm:$0xff] (!%p1373_p9) }
 0x34b   : > { %884 = vst.msk [vmem:[#allocation3 + $0x30] sm:$0xff] %vm877_vm14, %v875_v22  ;;  %v969_v53 = vld [vmem:[#allocation4 + $0x28] sm:$0xff] (!%p1373_p9)  ;;  %v976_v1 = vmul.f32 (!%p1373_p9), 0.00390625, %v968_v55  ;;  %v996_v15 = vadd.f32 (!%p1373_p9), 1e-05, %v988_v63 }
 0x34c   : > { %885 = vst.msk [vmem:[#allocation3 + $0x38] sm:$0xff] %vm877_vm14, %v876_v21  ;;  %v907_v24 = vpop.xlane.xlu0 %906  ;;  %v977_v58 = vmul.f32 (!%p1373_p9), 0.00390625, %v969_v53  ;;  %v997_v18 = vadd.f32 (!%p1373_p9), 1e-05, %v989_v4  ;;  %v1014_v53 = vld [vmem:[%s2229_s11 + $0x10] sm:$0xff] (!%p1373_p9)  ;;  %v1016_v55 = vld [vmem:[%s2229_s11 + $0x20] sm:$0xff] (!%p1373_p9) }
 0x34d   : > { %v909_v23 = vpop.xlane.xlu1 %908  ;;  %v920_v26 = vadd.f32 %v907_v24, %v888_v12  ;;  %v992_v10 = vsub.f32 (!%p1373_p9), %v976_v1, %v984_v5 }
 0x34e   : > { %v921_v25 = vadd.f32 %v909_v23, %v889_v11  ;;  %947 = sbr.rel (%p1373_p9) target bundleno = 1035 (0x40b), region = 52  ;;  %v950_v33 = vld [vmem:[#allocation3 + $0x10] sm:$0xff] (!%p1373_p9)  ;;  %v993_v9 = vsub.f32 (!%p1373_p9), %v977_v58, %v985_v3 }
 0x34f   : > { %928 = vst.msk [vmem:[#allocation4 + $0x10] sm:$0xff] %vm877_vm14, %v920_v26  ;;  %v2412_v37 = vmul.f32 (!%p1373_p9), 0.00390625, %v950_v33  ;;  %v951_v41 = vld [vmem:[#allocation3 + $0x18] sm:$0xff] (!%p1373_p9)  ;;  %v1000_v12 = vadd.f32 (!%p1373_p9), 1e-05, %v992_v10 }
 0x350   : > { %929 = vst.msk [vmem:[#allocation4 + $0x18] sm:$0xff] %vm877_vm14, %v921_v25  ;;  %v915_v30 = vpop.xlane.xlu0 %914  ;;  %v2416_v44 = vmul.f32 (!%p1373_p9), 0.00390625, %v951_v41  ;;  %v1001_v21 = vadd.f32 (!%p1373_p9), 1e-05, %v993_v9  ;;  %v1021_v58 = vld [vmem:[%s2229_s11 + $0x48] sm:$0xff] (!%p1373_p9) }
 0x351   : > { %v917_v29 = vpop.xlane.xlu1 %916  ;;  %v924_v32 = vadd.f32 %v915_v30, %v892_v28  ;;  %v982_v49 = vmul.f32 (!%p1373_p9), %v2412_v37, %v2412_v37 }
 0x352   : > { %v925_v31 = vadd.f32 %v917_v29, %v893_v27  ;;  %v983_v56 = vmul.f32 (!%p1373_p9), %v2416_v44, %v2416_v44  ;;  %v954_v13 = vld [vmem:[#allocation3 + $0x30] sm:$0xff] (!%p1373_p9) }
 0x353   : > { %932 = vst.msk [vmem:[#allocation4 + $0x30] sm:$0xff] %vm877_vm14, %v924_v32  ;;  %v955_v60 = vld [vmem:[#allocation3 + $0x38] sm:$0xff] (!%p1373_p9)  ;;  %v962_v19 = vmul.f32 (!%p1373_p9), 0.00390625, %v954_v13 }
 0x354   : > { %933 = vst.msk [vmem:[#allocation4 + $0x38] sm:$0xff] %vm877_vm14, %v925_v31  ;;  %v963_v7 = vmul.f32 (!%p1373_p9), 0.00390625, %v955_v60  ;;  %v1023_v60 = vld [vmem:[%s2229_s11 + $0x58] sm:$0xff] (!%p1373_p9) }
 0x355   : > { %v986_v11 = vmul.f32 %v962_v19, %v962_v19 }
 0x356   : > { %v966_v34 = vld [vmem:[#allocation4 + $0x10] sm:$0xff]  ;;  %v987_v17 = vmul.f32 %v963_v7, %v963_v7 }
 0x357   : > { %v974_v38 = vmul.f32 0.00390625, %v966_v34  ;;  %v967_v42 = vld [vmem:[#allocation4 + $0x18] sm:$0xff] }
 0x358   : > { %v975_v45 = vmul.f32 0.00390625, %v967_v42 }
 0x359   : > { %v990_v62 = vsub.f32 %v974_v38, %v982_v49  ;;  %v1019_v49 = vld [vmem:[%s2229_s11 + $0x38] sm:$0xff] }
 0x35a   : > { %v991_v2 = vsub.f32 %v975_v45, %v983_v56  ;;  %v970_v8 = vld [vmem:[#allocation4 + $0x30] sm:$0xff] }
 0x35b   : > { %v971_v61 = vld [vmem:[#allocation4 + $0x38] sm:$0xff]  ;;  %v998_v14 = vadd.f32 1e-05, %v990_v62  ;;  %v978_v20 = vmul.f32 0.00390625, %v970_v8  ;;  %v1028_v8 = vld [vmem:[%s2229_s11 + $0x80] sm:$0xff] }
 0x35c   : > { %v979_v6 = vmul.f32 0.00390625, %v971_v61  ;;  %v999_v16 = vadd.f32 1e-05, %v991_v2  ;;  %v1017_v56 = vld [vmem:[%s2229_s11 + $0x28] sm:$0xff]  ;;  %v1027_v2 = vld [vmem:[%s2229_s11 + $0x78] sm:$0xff] }
 0x35d   : > { %1658 = vrsqrt.f32 %v998_v14  ;;  %v994_v23 = vsub.f32 %v978_v20, %v986_v11  ;;  %v1025_v11 = vld [vmem:[%s2229_s11 + $0x68] sm:$0xff] }
 0x35e   : > { %1660 = vrsqrt.f32 %v996_v15  ;;  %v995_v22 = vsub.f32 %v979_v6, %v987_v17  ;;  %v1024_v17 = vld [vmem:[%s2229_s11 + $0x60] sm:$0xff] }
 0x35f   : > { %1662 = vrsqrt.f32 %v999_v16  ;;  %v1002_v25 = vadd.f32 1e-05, %v994_v23  ;;  %v1029_v16 = vld [vmem:[%s2229_s11 + $0x88] sm:$0xff] }
 0x360   : > { %1664 = vrsqrt.f32 %v997_v18  ;;  %v1003_v24 = vadd.f32 1e-05, %v995_v22 }
 0x361   : > { %1666 = vrsqrt.f32 %v1001_v21 }
 0x362   : > { %1668 = vrsqrt.f32 %v1000_v12 }
 0x363   : > { %1670 = vrsqrt.f32 %v1003_v24 }
 0x364   : > { %1672 = vrsqrt.f32 %v1002_v25 }
 0x367   : > { %v1659_v26 = vpop.eup %1658 }
 0x368   : > { %v1661_v27 = vpop.eup %1660  ;;  %1048 = vperm.xlu1 %1657, %v1659_v26   ;;  %v1102_v38 = vmul.f32 %v1659_v26, %v2412_v37  ;;  %v1026_v26 = vld [vmem:[%s2229_s11 + $0x70] sm:$0xff] }
 0x369   : > { %v1663_v28 = vpop.eup %1662  ;;  %1038 = vperm.xlu0 %1656, %v1661_v27   ;;  %v1100_v35 = vmul.f32 %v1661_v27, %v2414_v39 }
 0x36a   : > { %v1665_v29 = vpop.eup %1664  ;;  %v1103_v36 = vmul.f32 %v1663_v28, %v2416_v44 }
 0x36b   : > { %v1667_v30 = vpop.eup %1666  ;;  %v1101_v34 = vmul.f32 %v1665_v29, %v957_v51  ;;  %v1012_v51 = vld [vmem:[%s2229_s11] sm:$0xff] }
 0x36c   : > { %1053 = vperm.xlu1 %1657, %v1663_v28   ;;  %v1669_v31 = vpop.eup %1668  ;;  %v1105_v40 = vmul.f32 %v1667_v30, %v2424_v57 }
 0x36d   : > { %1043 = vperm.xlu0 %1656, %v1665_v29   ;;  %v1671_v32 = vpop.eup %1670  ;;  %v1104_v41 = vmul.f32 %v1669_v31, %v2426_v59  ;;  %v1022_v59 = vld [vmem:[%s2229_s11 + $0x50] sm:$0xff] }
 0x36e   : > { %v1673_v33 = vpop.eup %1672  ;;  %v1107_v42 = vmul.f32 %v1671_v32, %v963_v7 }
 0x36f   : > { %v1106_v39 = vmul.f32 %v1673_v33, %v962_v19 }
 0x370   : > { %1063 = vperm.xlu1 %1657, %v1667_v30  }
 0x371   : > { %1058 = vperm.xlu0 %1656, %v1669_v31   ;;  %v1033_v31 = vld [vmem:[%s2229_s11 + $0xa8] sm:$0xff] }
 0x374   : > { %1073 = vperm.xlu1 %1657, %v1671_v32  }
 0x375   : > { %1068 = vperm.xlu0 %1656, %v1673_v33  }
 0x378   : > { %1115 = vperm.xlu1 %1657, %v1101_v34  }
 0x379   : > { %1110 = vperm.xlu0 %1656, %v1100_v35  }
 0x37c   : > { %1125 = vperm.xlu1 %1657, %v1103_v36  }
 0x37d   : > { %1120 = vperm.xlu0 %1656, %v1102_v38   ;;  %v1034_v38 = vld [vmem:[%s2229_s11 + $0xb0] sm:$0xff] }
 0x380   : > { %1135 = vperm.xlu1 %1657, %v1105_v40  }
 0x381   : > { %1130 = vperm.xlu0 %1656, %v1104_v41  }
 0x384   : > { %1145 = vperm.xlu1 %1657, %v1107_v42  }
 0x385   : > { %1140 = vperm.xlu0 %1656, %v1106_v39  }
 0x3e7   : > { %v1049_v37 = vpop.permute.xlu1 %1048 }
 0x3e8   : > { %v1039_v43 = vpop.permute.xlu0 %1038  ;;  %v1082_v62 = vmul.f32 %v1049_v37, %v1018_v48  ;;  %v1083_v63 = vmul.f32 %v1049_v37, %v1019_v49  ;;  %v1084_v0 = vmul.f32 %v1049_v37, %v1020_v50  ;;  %v1030_v49 = vld [vmem:[%s2229_s11 + $0x90] sm:$0xff] }
 0x3e9   : > { %v1076_v1 = vmul.f32 %v1039_v43, %v1012_v51  ;;  %v1077_v3 = vmul.f32 %v1039_v43, %v1013_v52  ;;  %v1078_v14 = vmul.f32 %v1039_v43, %v1014_v53  ;;  %v1035_v43 = vld [vmem:[%s2229_s11 + $0xb8] sm:$0xff] }
 0x3eb   : > { %v1054_v44 = vpop.permute.xlu1 %1053 }
 0x3ec   : > { %v1044_v45 = vpop.permute.xlu0 %1043  ;;  %v1085_v15 = vmul.f32 %v1054_v44, %v1021_v58  ;;  %v1086_v4 = vmul.f32 %v1054_v44, %v1022_v59  ;;  %v1087_v6 = vmul.f32 %v1054_v44, %v1023_v60  ;;  %v1032_v60 = vld [vmem:[%s2229_s11 + $0xa0] sm:$0xff] }
 0x3ed   : > { %v1079_v5 = vmul.f32 %v1044_v45, %v1015_v54  ;;  %v1080_v7 = vmul.f32 %v1044_v45, %v1016_v55  ;;  %v1081_v13 = vmul.f32 %v1044_v45, %v1017_v56 }
 0x3ef   : > { %v1064_v46 = vpop.permute.xlu1 %1063 }
 0x3f0   : > { %v1059_v47 = vpop.permute.xlu0 %1058  ;;  %v2456_v10 = vmul.f32 %v1064_v46, %v1027_v2  ;;  %v1092_v22 = vmul.f32 %v1064_v46, %v1028_v8  ;;  %v1093_v25 = vmul.f32 %v1064_v46, %v1029_v16 }
 0x3f1   : > { %v1088_v30 = vmul.f32 %v1059_v47, %v1024_v17  ;;  %v1089_v36 = vmul.f32 %v1059_v47, %v1025_v11  ;;  %v1090_v37 = vmul.f32 %v1059_v47, %v1026_v26  ;;  %v1031_v47 = vld [vmem:[%s2229_s11 + $0x98] sm:$0xff] }
 0x3f3   : > { %v2446_v57 = vpop.permute.xlu1 %1073 }
 0x3f4   : > { %v2451_v61 = vpop.permute.xlu0 %1068  ;;  %v1097_v48 = vmul.f32 %v2446_v57, %v1033_v31  ;;  %v1098_v53 = vmul.f32 %v2446_v57, %v1034_v38  ;;  %v1099_v59 = vmul.f32 %v2446_v57, %v1035_v43 }
 0x3f5   : > { %v1094_v2 = vmul.f32 %v2451_v61, %v1030_v49 }
 0x3f7   : > { %v1116_v9 = vpop.permute.xlu1 %1115 }
 0x3f8   : > { %v1151_v18 = vsub.f32 %v1079_v5, %v1116_v9  ;;  %v1152_v19 = vsub.f32 %v1080_v7, %v1116_v9  ;;  %v1153_v20 = vsub.f32 %v1081_v13, %v1116_v9  ;;  %v1111_v21 = vpop.permute.xlu0 %1110  ;;  %v1095_v7 = vmul.f32 %v2451_v61, %v1031_v47 }
 0x3f9   : > { %v1148_v12 = vsub.f32 %v1076_v1, %v1111_v21  ;;  %v1149_v23 = vsub.f32 %v1077_v3, %v1111_v21  ;;  %v1150_v24 = vsub.f32 %v1078_v14, %v1111_v21 }
 0x3fa   : > { %v1175_v27 = vmax.f32 %v1151_v18, 0.0  ;;  %v1176_v28 = vmax.f32 %v1152_v19, 0.0  ;;  %v1177_v29 = vmax.f32 %v1153_v20, 0.0 }
 0x3fb   : > { %v1172_v32 = vmax.f32 %v1148_v12, 0.0  ;;  %v1173_v33 = vmax.f32 %v1149_v23, 0.0  ;;  %v1174_v34 = vmax.f32 %v1150_v24, 0.0  ;;  %v1126_v35 = vpop.permute.xlu1 %1125 }
 0x3fc   : > { %1199 = vst [vmem:[%s2229_s11 + $0x18] sm:$0xff] %v1175_v27  ;;  %1200 = vst [vmem:[%s2229_s11 + $0x20] sm:$0xff] %v1176_v28  ;;  %v1157_v40 = vsub.f32 %v1085_v15, %v1126_v35  ;;  %v1158_v41 = vsub.f32 %v1086_v4, %v1126_v35  ;;  %v1159_v42 = vsub.f32 %v1087_v6, %v1126_v35  ;;  %v1121_v39 = vpop.permute.xlu0 %1120 }
 0x3fd   : > { %1201 = vst [vmem:[%s2229_s11 + $0x28] sm:$0xff] %v1177_v29  ;;  %1196 = vst [vmem:[%s2229_s11] sm:$0xff] %v1172_v32  ;;  %v1154_v44 = vsub.f32 %v1082_v62, %v1121_v39  ;;  %v1155_v45 = vsub.f32 %v1083_v63, %v1121_v39  ;;  %v1156_v46 = vsub.f32 %v1084_v0, %v1121_v39 }
 0x3fe   : > { %1197 = vst [vmem:[%s2229_s11 + $0x8] sm:$0xff] %v1173_v33  ;;  %1198 = vst [vmem:[%s2229_s11 + $0x10] sm:$0xff] %v1174_v34  ;;  %v1181_v50 = vmax.f32 %v1157_v40, 0.0  ;;  %v1182_v51 = vmax.f32 %v1158_v41, 0.0  ;;  %v1183_v52 = vmax.f32 %v1159_v42, 0.0  ;;  %v1096_v15 = vmul.f32 %v2451_v61, %v1032_v60 }
 0x3ff   : > { %v1178_v54 = vmax.f32 %v1154_v44, 0.0  ;;  %v1179_v55 = vmax.f32 %v1155_v45, 0.0  ;;  %v1180_v56 = vmax.f32 %v1156_v46, 0.0  ;;  %v1136_v58 = vpop.permute.xlu1 %1135 }
 0x400   : > { %1205 = vst [vmem:[%s2229_s11 + $0x48] sm:$0xff] %v1181_v50  ;;  %1206 = vst [vmem:[%s2229_s11 + $0x50] sm:$0xff] %v1182_v51  ;;  %v1163_v62 = vsub.f32 %v2456_v10, %v1136_v58  ;;  %v1164_v63 = vsub.f32 %v1092_v22, %v1136_v58  ;;  %v1165_v0 = vsub.f32 %v1093_v25, %v1136_v58  ;;  %v1131_v1 = vpop.permute.xlu0 %1130 }
 0x401   : > { %1207 = vst [vmem:[%s2229_s11 + $0x58] sm:$0xff] %v1183_v52  ;;  %1202 = vst [vmem:[%s2229_s11 + $0x30] sm:$0xff] %v1178_v54  ;;  %v1160_v3 = vsub.f32 %v1088_v30, %v1131_v1  ;;  %v1161_v5 = vsub.f32 %v1089_v36, %v1131_v1  ;;  %v1162_v57 = vsub.f32 %v1090_v37, %v1131_v1 }
 0x402   : > { %1203 = vst [vmem:[%s2229_s11 + $0x38] sm:$0xff] %v1179_v55  ;;  %1204 = vst [vmem:[%s2229_s11 + $0x40] sm:$0xff] %v1180_v56  ;;  %v1187_v13 = vmax.f32 %v1163_v62, 0.0  ;;  %v1188_v8 = vmax.f32 %v1164_v63, 0.0  ;;  %v1189_v14 = vmax.f32 %v1165_v0, 0.0 }
 0x403   : > { %v1184_v4 = vmax.f32 %v1160_v3, 0.0  ;;  %v1185_v6 = vmax.f32 %v1161_v5, 0.0  ;;  %v1186_v16 = vmax.f32 %v1162_v57, 0.0  ;;  %v1146_v9 = vpop.permute.xlu1 %1145 }
 0x404   : > { %1211 = vst [vmem:[%s2229_s11 + $0x78] sm:$0xff] %v1187_v13  ;;  %1212 = vst [vmem:[%s2229_s11 + $0x80] sm:$0xff] %v1188_v8  ;;  %v1169_v10 = vsub.f32 %v1097_v48, %v1146_v9  ;;  %v1170_v17 = vsub.f32 %v1098_v53, %v1146_v9  ;;  %v1171_v18 = vsub.f32 %v1099_v59, %v1146_v9  ;;  %v1141_v19 = vpop.permute.xlu0 %1140 }
 0x405   : > { %1213 = vst [vmem:[%s2229_s11 + $0x88] sm:$0xff] %v1189_v14  ;;  %1208 = vst [vmem:[%s2229_s11 + $0x60] sm:$0xff] %v1184_v4  ;;  %v1166_v61 = vsub.f32 %v1094_v2, %v1141_v19  ;;  %v1167_v20 = vsub.f32 %v1095_v7, %v1141_v19  ;;  %v1168_v21 = vsub.f32 %v1096_v15, %v1141_v19 }
 0x406   : > { %1209 = vst [vmem:[%s2229_s11 + $0x68] sm:$0xff] %v1185_v6  ;;  %1210 = vst [vmem:[%s2229_s11 + $0x70] sm:$0xff] %v1186_v16  ;;  %v1193_v22 = vmax.f32 %v1169_v10, 0.0  ;;  %v1194_v11 = vmax.f32 %v1170_v17, 0.0  ;;  %v1195_v12 = vmax.f32 %v1171_v18, 0.0 }
 0x407   : > { %v1190_v23 = vmax.f32 %v1166_v61, 0.0  ;;  %v1191_v24 = vmax.f32 %v1167_v20, 0.0  ;;  %v1192_v25 = vmax.f32 %v1168_v21, 0.0 }
 0x408   : > { %1217 = vst [vmem:[%s2229_s11 + $0xa8] sm:$0xff] %v1193_v22  ;;  %1218 = vst [vmem:[%s2229_s11 + $0xb0] sm:$0xff] %v1194_v11 }
 0x409   : > { %1219 = vst [vmem:[%s2229_s11 + $0xb8] sm:$0xff] %v1195_v12  ;;  %1214 = vst [vmem:[%s2229_s11 + $0x90] sm:$0xff] %v1190_v23 }
 0x40a   : > { %1215 = vst [vmem:[%s2229_s11 + $0x98] sm:$0xff] %v1191_v24  ;;  %1216 = vst [vmem:[%s2229_s11 + $0xa0] sm:$0xff] %v1192_v25 }
 0x40b PF: > { %s1437_s18 = smul.u32 3072, %s1880_s19  ;;  %s1234_s0 = sshll.u32 %s2229_s11, 4  ;;  %s2505_s0 = int_to_ptr.vmem [resolvable:$true] %s1234_s0 }
 0x40c   : > { %s1221_s4 = scalar_lea.sflag [#allocation7], %s2214_s2  ;;  %s1762_s30 = scalar_lea.vmem %s2505_s0, 3072 }
 0x40d   : > { %s2503_s26 = scalar_lea.hbm %s2571_s3, %s1437_s18  ;;  %p1763_p13 = scmp.ne.s32.totalorder %s2505_s0, %s1762_s30 }
 0x40e   : > { %p2607_p2 = scmp.ne.s32.totalorder %s2595_s9, 0  ;;  %s1947_s25 = smov [#allocation11]  }
 0x40f   : > { %s1766_s7 = sshll.u32 %s1947_s25, 4  ;;  %s1767_s7 = int_to_ptr.vmem [resolvable:$false] %s1766_s7 }
 0x410   : > { %p1764_p7 = pnand %p1763_p13, %p2607_p2  ;;  %s1768_s19 = scalar_lea.vmem %s1767_s7, 6144 }
 0x411   : > { %p1769_p5 = scmp.lt.s32.totalorder %s2505_s0, %s1767_s7  ;;  %p1770_p12 = scmp.lt.s32.totalorder %s1768_s19, %s1762_s30 }
 0x412   : > { %p1765_p6 = pneg %p1764_p7 }
 0x413   : > { %p1771_p1 = por %p1770_p12, %p1769_p5 }
 0x415   : > { %p1772_p11 = pnand %p1771_p1, %p1765_p6 }
 0x417   : > { %1775 = shalt.err (!%p1772_p11)
}
 0x418   : > { %s1776_s11 = scalar_lea.hbm %s2503_s26, 3072  ;;  %s1780_s21 = scalar_lea.hbm %s2571_s3, 6144 }
 0x419   : > { %p1777_p0 = scmp.ne.s32.totalorder %s2503_s26, %s1776_s11  ;;  %p1781_p3 = scmp.lt.u32.totalorder %s2503_s26, %s2571_s3 }
 0x41a   : > { %p1782_p8 = scmp.lt.u32.totalorder %s1780_s21, %s1776_s11  ;;  %p1784_p13 = scmp.lt.u32.totalorder %s1776_s11, %s2503_s26 }
 0x41b   : > { %p1778_p10 = pnand %p1777_p0, %p2607_p2 }
 0x41c   : > { %p1783_p9 = por %p1782_p8, %p1781_p3 }
 0x41d   : > { %p1779_p4 = pneg %p1778_p10 }
 0x41e   : > { %p1785_p7 = por %p1784_p13, %p1783_p9 }
 0x420   : > { %p1786_p6 = pnand %p1785_p7, %p1779_p4 }
 0x422   : > { %1789 = shalt.err (!%p1786_p6)
}
 0x423   : > { %s1948_s24 = smov 384   ;;  %s1949_s29 = smov 24  }
 0x424   : > { %1446 = dma.vmem_to_hbm [thread:$0]  (%p2607_p2), %s2505_s0, 3072, %s2503_s26, %s1221_s4, %s1948_s24, %s1948_s24, %s1949_s29  }
 0x425 PF: > { %p1466_p5 = scmp.ge.s32.totalorder %s1892_s22, 2  ;;  %s1249_s18 = sand.u32 1, %s1852_s12  }
 0x426   : > { %p2608_p12 = scmp.ne.s32.totalorder %s2600_s10, 0  ;;  %s1250_s23 = scalar_lea.sflag [#allocation7], %s1249_s18 }
 0x428   : > { %p1460_p1 = pnand %p1466_p5, %p2608_p12 }
 0x42a   : > { %1847 = dma.done.wait (!%p1460_p1), %s1250_s23, 3072  }
 0x42b   : > { %1849 = vsyncadd (!%p1460_p1), %s1250_s23, 4294964224  ;;  %s22_s22 = sadd.s32 1, %s1892_s22   ;;  %s2609_s18 = sld [smem:[#allocation16_spill]] }
 0x42c   : > { %p19_p11 = scmp.ge.s32.totalorder %s22_s22, 8   ;;  %s2610_s19 = sld [smem:[#allocation17_spill]] }
 0x42d   : > { %s2611_s20 = sld [smem:[#allocation18_spill]]  ;;  %s2612_s21 = sld [smem:[#allocation19_spill]] }
 0x42e   : > { %s2613_s12 = smov %s1856_s13  ;;  %s2614_s13 = smov %s1860_s14 }
 0x42f   : > { %s2615_s14 = smov %s2162_s27  ;;  %s2616_s15 = smov %s1868_s16 }
 0x430   : > { %s2617_s16 = smov %s1872_s17  ;;  %s2618_s17 = smov %s2087_s5 }
 0x431   :  { %21 = sbr.rel (!%p19_p11) target bundleno = 14 (0xe), region = 104 }
 0x438   :  { %1255 = vsyncpa [#allocation6], 1 }
 0x439   :  { %1257 = vsyncpa [#allocation6 + $0x1], 1 }
 0x43a   :  { %1258 = vsyncpa [#allocation9], 1 }
 0x43b   :  { %1260 = vsyncpa [#allocation9 + $0x1], 1 }
 0x43c   :  { %1261 = vsyncpa [#allocation7], 1 }
 0x43d   :  { %1263 = vsyncpa [#allocation7 + $0x1], 1 }

</bundles_post_ra>
